<compile_context>
chip_gen: v7x
topology: tpu7x:2x2x1
jax: 0.10.0
libtpu: 0.0.40
codegen_flags: <defaults>
</compile_context>

<pallas_src>
import functools

import jax
import jax.numpy as jnp
from jax import lax
from jax.experimental import pallas as pl
from jax.experimental.pallas import tpu as pltpu

_NEG_INF = -1e30


def _round_up(x, m):
    return ((x + m - 1) // m) * m


def _pick_kv_tile(lp):
    # multiple of 128 that divides lp, keeping the (lp, tile) energy/probs
    # f32 temporaries around <= 12 MiB combined (fits v7x scoped VMEM).
    t = min(lp, 512)
    while t > 128 and (lp % t != 0 or 2 * 4 * lp * t > 12 * 1024 * 1024):
        t -= 128
    return t


def _vmem_limit_bytes(need_bytes):
    try:
        cap = pltpu.get_tpu_info().vmem_capacity_bytes
    except Exception:
        cap = 64 * 1024 * 1024  # conservative: v7x physical VMEM per core
    return int(min((cap * 3) // 4, max(16 * 1024 * 1024, need_bytes)))


# ---------------------------------------------------------------------------
# Fused kernel: conv-FF + InstanceNorm + attention + conv_out + conv_1x1 + res
# ---------------------------------------------------------------------------
def _att_module_kernel(x_ref, mask_ref,
                       wff_ref, bff_ref, wqkv_ref, bqkv_ref,
                       wo_ref, bo_ref, w1_ref, b1_ref,
                       o_ref,
                       xpad_ref, qkv_ref, mrun_sc, lrun_sc, acc_sc,
                       *, dilation, length, cq, cv, alpha, eps, kv_tile):
    c, lp = x_ref.shape
    d = dilation

    x = x_ref[...]                     # (C, Lp) f32 (zero padded beyond `length`)
    m_row = mask_ref[...]              # (1, Lp) f32 mask row (zero beyond `length`)
    col = lax.broadcasted_iota(jnp.int32, (1, lp), 1)

    # ---- _ConvFeedForward: dilated Conv1d(k=3, 'same' padding) + ReLU ------
    zero_halo = jnp.zeros((c, d), jnp.float32)
    xpad_ref[:, :d] = zero_halo
    xpad_ref[:, d + lp:] = zero_halo
    xpad_ref[:, d:d + lp] = x
    acc = jnp.broadcast_to(bff_ref[...], (c, lp)).astype(jnp.float32)
    for kk in range(3):  # static unroll over the 3 taps (bf16 MXU, f32 accum)
        tap = xpad_ref[:, kk * d:kk * d + lp].astype(jnp.bfloat16)
        acc = acc + jnp.dot(wff_ref[kk], tap, preferred_element_type=jnp.float32)
    ff = jnp.maximum(acc, 0.0)                                   # (C, Lp)

    # ---- InstanceNorm1d (affine=False), stats over the original L only -----
    valid = (col < length).astype(jnp.float32)                   # (1, Lp)
    inv_n = 1.0 / float(length)
    mu = jnp.sum(ff * valid, axis=-1, keepdims=True) * inv_n
    diff = (ff - mu) * valid
    var = jnp.sum(diff * diff, axis=-1, keepdims=True) * inv_n
    xn = (ff - mu) * lax.rsqrt(var + eps)

    # ---- stacked q/k/v 1x1 convolutions: one bf16 MXU matmul ---------------
    qkv_ref[...] = jnp.dot(wqkv_ref[...], xn.astype(jnp.bfloat16),
                           preferred_element_type=jnp.float32) + bqkv_ref[...]
    q_bf = qkv_ref[pl.ds(0, cq), :].astype(jnp.bfloat16)         # (CQ, Lp)

    # ---- masked scalar-dot attention: online softmax over key tiles --------
    mrun_sc[...] = jnp.full((lp, 1), _NEG_INF, jnp.float32)
    lrun_sc[...] = jnp.zeros((lp, 1), jnp.float32)
    acc_sc[...] = jnp.zeros((lp, cv), jnp.float32)
    scale = 1.0 / (float(cq) ** 0.5)

    @pl.loop(0, lp // kv_tile)
    def _(j):
        start = pl.multiple_of(j * kv_tile, kv_tile)
        k_t = qkv_ref[pl.ds(cq, cq), pl.ds(start, kv_tile)].astype(jnp.bfloat16)
        v_t = qkv_ref[pl.ds(2 * cq, cv), pl.ds(start, kv_tile)].astype(jnp.bfloat16)
        m_t = mask_ref[:, pl.ds(start, kv_tile)]                 # (1, Tk)
        col_t = start + lax.broadcasted_iota(jnp.int32, (1, kv_tile), 1)
        # additive key mask: log(mask+1e-6) inside the original L, -inf beyond
        add_t = jnp.where(col_t < length, jnp.log(m_t + 1e-6), _NEG_INF)

        e = lax.dot_general(q_bf, k_t, (((0,), (0,)), ((), ())),
                            preferred_element_type=jnp.float32) * scale + add_t
        m_old = mrun_sc[...]
        m_new = jnp.maximum(m_old, jnp.max(e, axis=-1, keepdims=True))
        corr = jnp.exp(m_old - m_new)
        p = jnp.exp(e - m_new)                                   # (Lp, Tk)
        lrun_sc[...] = lrun_sc[...] * corr + jnp.sum(p, axis=-1, keepdims=True)
        # numerator uses the multiplicative key mask (matches att = softmax * mask)
        pv = lax.dot_general((p * m_t).astype(jnp.bfloat16), v_t,
                             (((1,), (1,)), ((), ())),
                             preferred_element_type=jnp.float32)  # (Lp, CV)
        acc_sc[...] = acc_sc[...] * corr + pv
        mrun_sc[...] = m_new

    out_v = acc_sc[...] * pl.reciprocal(lrun_sc[...], approx=True)  # (Lp, CV)

    # conv_out(ReLU(out_v)) -- dot_general consumes (Lp, CV) directly (no .T)
    att_out = lax.dot_general(wo_ref[...], jnp.maximum(out_v, 0.0),
                              (((1,), (1,)), ((), ())),
                              preferred_element_type=jnp.float32) + bo_ref[...]
    att_out = att_out * m_row

    h = alpha * att_out + ff
    h = jnp.dot(w1_ref[...], h, preferred_element_type=jnp.float32) + b1_ref[...]
    # TODO(synk): nn.Dropout() is identity in eval mode; train-mode dropout not implemented.
    o_ref[...] = ((x + h) * m_row).astype(o_ref.dtype)


# ---------------------------------------------------------------------------
# Wrapper
# ---------------------------------------------------------------------------
def att_module_forward(x, f, mask, params, *, dilation, alpha,
                       att_type="normal_att", stage="encoder"):
    """_AttModule.forward (eval mode): feed_forward -> attention -> conv_1x1 -> residual."""
    # TODO(synk): only att_type='normal_att' + stage='encoder' are wired up; block_att /
    # sliding_att reuse the same scalar-dot core after a wrapper-side block reshape, and
    # 'decoder' only changes the value source to f.
    assert att_type == "normal_att" and stage == "encoder"
    del f

    n, c, length = x.shape
    cq = params["wq"].shape[0]
    cv = params["wv"].shape[0]
    p_rows = 2 * cq + cv

    lp = max(128, _round_up(length, 128))       # lane-dense padded length
    kv_tile = _pick_kv_tile(lp)
    pad = lp - length

    x_p = jnp.pad(x.astype(jnp.float32), ((0, 0), (0, 0), (0, pad)))
    m_p = jnp.pad(mask[:, 0:1, :].astype(jnp.float32), ((0, 0), (0, 0), (0, pad)))

    w_taps = jnp.transpose(params["ff_w"], (2, 0, 1)).astype(jnp.bfloat16)   # (3, C, C)
    b_ff = params["ff_b"].reshape(c, 1).astype(jnp.float32)
    w_qkv = jnp.concatenate([params["wq"], params["wk"], params["wv"]],
                            axis=0).astype(jnp.bfloat16)                    # (2CQ+CV, C)
    b_qkv = jnp.concatenate([params["bq"], params["bk"], params["bv"]],
                            axis=0).reshape(p_rows, 1).astype(jnp.float32)
    wo = params["wo"].astype(jnp.float32)
    bo = params["bo"].reshape(c, 1).astype(jnp.float32)
    w1 = params["w1"].astype(jnp.float32)
    b1 = params["b1"].reshape(c, 1).astype(jnp.float32)

    kernel = functools.partial(
        _att_module_kernel, dilation=dilation, length=length,
        cq=cq, cv=cv, alpha=alpha, eps=1e-5, kv_tile=kv_tile)

    def const_spec(shape):
        zeros = (0,) * len(shape)
        return pl.BlockSpec(shape, lambda i: zeros)

    # working-set estimate: double-buffered IO blocks, in-kernel values,
    # energy/probs temporaries, scratch (the (Lp,1)/(Lp,CV) pads to 128 lanes).
    need = (2 * 4 * (2 * c * lp + lp)
            + 4 * (8 * c * lp + 2 * p_rows * lp)
            + 4 * c * (lp + 2 * dilation)
            + 4 * 3 * lp * kv_tile
            + 4 * 3 * lp * 128
            + (4 << 20))

    out = pl.pallas_call(
        kernel,
        out_shape=jax.ShapeDtypeStruct((n, c, lp), jnp.float32),
        grid_spec=pltpu.PrefetchScalarGridSpec(
            num_scalar_prefetch=0,
            grid=(n,),
            in_specs=[
                pl.BlockSpec((None, c, lp), lambda i: (i, 0, 0)),   # x (padded)
                pl.BlockSpec((None, 1, lp), lambda i: (i, 0, 0)),   # mask row (padded)
                const_spec((3, c, c)), const_spec((c, 1)),          # conv-ff W / b
                const_spec((p_rows, c)), const_spec((p_rows, 1)),   # stacked q/k/v W / b
                const_spec((c, cv)), const_spec((c, 1)),            # conv_out W / b
                const_spec((c, c)), const_spec((c, 1)),             # conv_1x1 W / b
            ],
            out_specs=pl.BlockSpec((None, c, lp), lambda i: (i, 0, 0)),
            scratch_shapes=[
                pltpu.VMEM((c, lp + 2 * dilation), jnp.float32),    # conv halo
                pltpu.VMEM((p_rows, lp), jnp.float32),              # stacked q/k/v
                pltpu.VMEM((lp, 1), jnp.float32),                   # running max
                pltpu.VMEM((lp, 1), jnp.float32),                   # running denom
                pltpu.VMEM((lp, cv), jnp.float32),                  # attn accumulator
            ],
        ),
        compiler_params=pltpu.CompilerParams(
            dimension_semantics=("parallel",),
            vmem_limit_bytes=_vmem_limit_bytes(need),
        ),
    )(x_p, m_p, w_taps, b_ff, w_qkv, b_qkv, wo, bo, w1, b1)

    return out[:, :, :length]


# ---------------------------------------------------------------------------
# Pure-JAX reference (mirrors the PyTorch module; matmul inputs cast to bf16 to
# mirror the kernel's bf16-input / f32-accumulate MXU contract).
# ---------------------------------------------------------------------------
def _reference(x, f, mask, params, dilation, alpha):
    del f
    eps = 1e-5
    hp = lax.Precision.HIGHEST
    bf = lambda t: t.astype(jnp.bfloat16).astype(jnp.float32)

    def conv1x1(t, w, b, cast=False):
        tt, ww = (bf(t), bf(w)) if cast else (t, w)
        return jnp.einsum("oc,ncl->nol", ww, tt, precision=hp) + b[None, :, None]

    ff = lax.conv_general_dilated(
        bf(x), bf(params["ff_w"]), window_strides=(1,),
        padding=[(dilation, dilation)], rhs_dilation=(dilation,),
        dimension_numbers=("NCH", "OIH", "NCH"), precision=hp)
    ff = jnp.maximum(ff + params["ff_b"][None, :, None], 0.0)

    mu = jnp.mean(ff, axis=-1, keepdims=True)
    var = jnp.mean(jnp.square(ff - mu), axis=-1, keepdims=True)
    xn = (ff - mu) * lax.rsqrt(var + eps)

    q = conv1x1(xn, params["wq"], params["bq"], cast=True)
    k = conv1x1(xn, params["wk"], params["bk"], cast=True)
    v = conv1x1(xn, params["wv"], params["bv"], cast=True)

    m = mask[:, 0:1, :]
    energy = jnp.einsum("ncl,nck->nlk", bf(q), bf(k), precision=hp) / (q.shape[1] ** 0.5)
    energy = energy + jnp.log(m + 1e-6)
    emax = jnp.max(energy, axis=-1, keepdims=True)
    probs = jnp.exp(energy - emax)
    att = probs / jnp.sum(probs, axis=-1, keepdims=True)
    att = att * m
    out_v = jnp.einsum("nck,nlk->ncl", bf(v), bf(att), precision=hp)
    att_out = conv1x1(jnp.maximum(out_v, 0.0), params["wo"], params["bo"]) * m

    h = alpha * att_out + ff
    h = conv1x1(h, params["w1"], params["b1"])
    return (x + h) * m


if __name__ == "__main__":
    key = jax.random.PRNGKey(0)
    N, C, L = 2, 8, 16        # batch, channels (in == out), length
    R1, R2 = 2, 2             # q/k and v channel reduction ratios
    DILATION = 2
    ALPHA = 1.0
    CQ, CV = C // R1, C // R2

    ks = jax.random.split(key, 14)

    def uinit(k, shape, fan_in):
        bound = 1.0 / (fan_in ** 0.5)
        return jax.random.uniform(k, shape, jnp.float32, -bound, bound)

    params = {
        "ff_w": uinit(ks[0], (C, C, 3), 3 * C), "ff_b": uinit(ks[1], (C,), 3 * C),
        "wq": uinit(ks[2], (CQ, C), C), "bq": uinit(ks[3], (CQ,), C),
        "wk": uinit(ks[4], (CQ, C), C), "bk": uinit(ks[5], (CQ,), C),
        "wv": uinit(ks[6], (CV, C), C), "bv": uinit(ks[7], (CV,), C),
        "wo": uinit(ks[8], (C, CV), CV), "bo": uinit(ks[9], (C,), CV),
        "w1": uinit(ks[10], (C, C), C), "b1": uinit(ks[11], (C,), C),
    }
    x = jax.random.normal(ks[12], (N, C, L), jnp.float32)
    f = jax.random.normal(ks[13], (N, C, L), jnp.float32)   # decoder features (unused: encoder)
    valid_len = jnp.array([L, L - 4])                       # batch 1 has 4 padded frames
    mask = (jnp.arange(L)[None, None, :] < valid_len[:, None, None]).astype(jnp.float32)

    fwd = jax.jit(functools.partial(att_module_forward, dilation=DILATION, alpha=ALPHA))
    out = jax.block_until_ready(fwd(x, f, mask, params))

    ref = _reference(x, f, mask, params, DILATION, ALPHA)
    assert out.shape == (N, C, L)
    err = float(jnp.max(jnp.abs(out - ref)))
    # tolerance covers bf16 MXU inputs, the online-softmax cast/normalisation
    # ordering, and the approximate (EUP) reciprocal in the softmax denominator.
    assert jnp.allclose(out, ref, atol=2e-2, rtol=2e-2), f"max abs err {err}"
    print("KERNEL_OK")
</pallas_src>

<mosaic_0001>
module attributes {stable_mosaic.version = 11 : i64} {
  func.func @_att_module_kernel(%arg0: i32, %arg1: memref<1x8x128xf32, #tpu.memory_space<vmem>>, %arg2: memref<1x1x128xf32, #tpu.memory_space<vmem>>, %arg3: memref<3x8x8xbf16, #tpu.memory_space<vmem>>, %arg4: memref<8x1xf32, #tpu.memory_space<vmem>>, %arg5: memref<12x8xbf16, #tpu.memory_space<vmem>>, %arg6: memref<12x1xf32, #tpu.memory_space<vmem>>, %arg7: memref<8x4xf32, #tpu.memory_space<vmem>>, %arg8: memref<8x1xf32, #tpu.memory_space<vmem>>, %arg9: memref<8x8xf32, #tpu.memory_space<vmem>>, %arg10: memref<8x1xf32, #tpu.memory_space<vmem>>, %arg11: memref<1x8x128xf32, #tpu.memory_space<vmem>>, %arg12: memref<8x132xf32, #tpu.memory_space<vmem>>, %arg13: memref<12x128xf32, #tpu.memory_space<vmem>>, %arg14: memref<128x1xf32, #tpu.memory_space<vmem>>, %arg15: memref<128x1xf32, #tpu.memory_space<vmem>>, %arg16: memref<128x4xf32, #tpu.memory_space<vmem>>) attributes {dimension_semantics = [#tpu.dimension_semantics<parallel>], iteration_bounds = array<i64: 2>, scalar_prefetch = 0 : i64, scratch_operands = 5 : i64, tpu.core_type = #tpu.core_type<tc>, window_params = [{transform_indices = @transform_0, window_bounds = array<i64: 1, 8, 128>}, {transform_indices = @transform_1, window_bounds = array<i64: 1, 1, 128>}, {pipeline_mode = #tpu.pipeline_mode<synchronous>, transform_indices = @transform_2, window_bounds = array<i64: 3, 8, 8>}, {pipeline_mode = #tpu.pipeline_mode<synchronous>, transform_indices = @transform_3, window_bounds = array<i64: 8, 1>}, {pipeline_mode = #tpu.pipeline_mode<synchronous>, transform_indices = @transform_4, window_bounds = array<i64: 12, 8>}, {pipeline_mode = #tpu.pipeline_mode<synchronous>, transform_indices = @transform_5, window_bounds = array<i64: 12, 1>}, {pipeline_mode = #tpu.pipeline_mode<synchronous>, transform_indices = @transform_6, window_bounds = array<i64: 8, 4>}, {pipeline_mode = #tpu.pipeline_mode<synchronous>, transform_indices = @transform_7, window_bounds = array<i64: 8, 1>}, {pipeline_mode = #tpu.pipeline_mode<synchronous>, transform_indices = @transform_8, window_bounds = array<i64: 8, 8>}, {pipeline_mode = #tpu.pipeline_mode<synchronous>, transform_indices = @transform_9, window_bounds = array<i64: 8, 1>}, {transform_indices = @transform_10, window_bounds = array<i64: 1, 8, 128>}]} {
    %c0 = arith.constant 0 : index
    %c0_0 = arith.constant 0 : index
    %c0_1 = arith.constant 0 : index
    %0 = vector.load %arg1[%c0, %c0_0, %c0_1] : memref<1x8x128xf32, #tpu.memory_space<vmem>>, vector<1x8x128xf32>
    %1 = vector.shape_cast %0 : vector<1x8x128xf32> to vector<8x128xf32>
    %c0_2 = arith.constant 0 : index
    %c0_3 = arith.constant 0 : index
    %c0_4 = arith.constant 0 : index
    %2 = vector.load %arg2[%c0_2, %c0_3, %c0_4] : memref<1x1x128xf32, #tpu.memory_space<vmem>>, vector<1x1x128xf32>
    %3 = vector.shape_cast %2 : vector<1x1x128xf32> to vector<1x128xf32>
    %4 = tpu.iota {dimensions = array<i32: 1>} : vector<1x128xi32>
    %cst = arith.constant 0.000000e+00 : f32
    %5 = vector.broadcast %cst : f32 to vector<8x2xf32>
    %c0_5 = arith.constant 0 : index
    %c0_6 = arith.constant 0 : index
    %6 = vector.load %arg12[%c0_5, %c0_6] : memref<8x132xf32, #tpu.memory_space<vmem>>, vector<8x2xf32>
    tpu.vector_store %arg12[%c0_5, %c0_6], %5 {strides = array<i32>} : memref<8x132xf32, #tpu.memory_space<vmem>>, vector<8x2xf32>,
    %c0_7 = arith.constant 0 : index
    %c130 = arith.constant 130 : index
    %7 = vector.load %arg12[%c0_7, %c130] : memref<8x132xf32, #tpu.memory_space<vmem>>, vector<8x2xf32>
    tpu.vector_store %arg12[%c0_7, %c130], %5 {strides = array<i32>} : memref<8x132xf32, #tpu.memory_space<vmem>>, vector<8x2xf32>,
    %c0_8 = arith.constant 0 : index
    %c2 = arith.constant 2 : index
    %8 = vector.load %arg12[%c0_8, %c2] : memref<8x132xf32, #tpu.memory_space<vmem>>, vector<8x128xf32>
    tpu.vector_store %arg12[%c0_8, %c2], %1 {strides = array<i32>} : memref<8x132xf32, #tpu.memory_space<vmem>>, vector<8x128xf32>,
    %c0_9 = arith.constant 0 : index
    %c0_10 = arith.constant 0 : index
    %9 = vector.load %arg4[%c0_9, %c0_10] : memref<8x1xf32, #tpu.memory_space<vmem>>, vector<8x1xf32>
    %10 = vector.shape_cast %9 : vector<8x1xf32> to vector<8x1xf32>
    %11 = vector.broadcast %10 : vector<8x1xf32> to vector<8x128xf32>
    %c0_11 = arith.constant 0 : index
    %c0_12 = arith.constant 0 : index
    %12 = vector.load %arg12[%c0_11, %c0_12] : memref<8x132xf32, #tpu.memory_space<vmem>>, vector<8x128xf32>
    %13 = arith.truncf %12 : vector<8x128xf32> to vector<8x128xbf16>
    %c0_13 = arith.constant 0 : index
    %c0_14 = arith.constant 0 : index
    %c0_15 = arith.constant 0 : index
    %14 = vector.load %arg3[%c0_13, %c0_14, %c0_15] : memref<3x8x8xbf16, #tpu.memory_space<vmem>>, vector<1x8x8xbf16>
    %15 = vector.shape_cast %14 : vector<1x8x8xbf16> to vector<8x8xbf16>
    %cst_16 = arith.constant dense<0.000000e+00> : vector<8x128xf32>
    %16 = tpu.matmul %15, %13, %cst_16 {dimension_numbers = #tpu.dot_dimension_numbers<[1], [0], [0], [1], [0, 0, 1, 1], [], []>} : vector<8x8xbf16>, vector<8x128xbf16>, vector<8x128xf32> -> vector<8x128xf32>
    %17 = arith.addf %11, %16 : vector<8x128xf32>
    %c0_17 = arith.constant 0 : index
    %c2_18 = arith.constant 2 : index
    %18 = vector.load %arg12[%c0_17, %c2_18] : memref<8x132xf32, #tpu.memory_space<vmem>>, vector<8x128xf32>
    %19 = arith.truncf %18 : vector<8x128xf32> to vector<8x128xbf16>
    %c1 = arith.constant 1 : index
    %c0_19 = arith.constant 0 : index
    %c0_20 = arith.constant 0 : index
    %20 = vector.load %arg3[%c1, %c0_19, %c0_20] : memref<3x8x8xbf16, #tpu.memory_space<vmem>>, vector<1x8x8xbf16>
    %21 = vector.shape_cast %20 : vector<1x8x8xbf16> to vector<8x8xbf16>
    %cst_21 = arith.constant dense<0.000000e+00> : vector<8x128xf32>
    %22 = tpu.matmul %21, %19, %cst_21 {dimension_numbers = #tpu.dot_dimension_numbers<[1], [0], [0], [1], [0, 0, 1, 1], [], []>} : vector<8x8xbf16>, vector<8x128xbf16>, vector<8x128xf32> -> vector<8x128xf32>
    %23 = arith.addf %17, %22 : vector<8x128xf32>
    %c0_22 = arith.constant 0 : index
    %c4 = arith.constant 4 : index
    %24 = vector.load %arg12[%c0_22, %c4] : memref<8x132xf32, #tpu.memory_space<vmem>>, vector<8x128xf32>
    %25 = arith.truncf %24 : vector<8x128xf32> to vector<8x128xbf16>
    %c2_23 = arith.constant 2 : index
    %c0_24 = arith.constant 0 : index
    %c0_25 = arith.constant 0 : index
    %26 = vector.load %arg3[%c2_23, %c0_24, %c0_25] : memref<3x8x8xbf16, #tpu.memory_space<vmem>>, vector<1x8x8xbf16>
    %27 = vector.shape_cast %26 : vector<1x8x8xbf16> to vector<8x8xbf16>
    %cst_26 = arith.constant dense<0.000000e+00> : vector<8x128xf32>
    %28 = tpu.matmul %27, %25, %cst_26 {dimension_numbers = #tpu.dot_dimension_numbers<[1], [0], [0], [1], [0, 0, 1, 1], [], []>} : vector<8x8xbf16>, vector<8x128xbf16>, vector<8x128xf32> -> vector<8x128xf32>
    %29 = arith.addf %23, %28 : vector<8x128xf32>
    %cst_27 = arith.constant 0.000000e+00 : f32
    %30 = vector.broadcast %cst_27 : f32 to vector<8x128xf32>
    %31 = arith.maximumf %29, %30 : vector<8x128xf32>
    %c16_i32 = arith.constant 16 : i32
    %32 = vector.broadcast %c16_i32 : i32 to vector<1x128xi32>
    %33 = arith.cmpi slt, %4, %32 : vector<1x128xi32>
    %34 = arith.extui %33 : vector<1x128xi1> to vector<1x128xi32>
    %35 = arith.sitofp %34 : vector<1x128xi32> to vector<1x128xf32>
    %36 = vector.broadcast %35 : vector<1x128xf32> to vector<8x128xf32>
    %37 = arith.mulf %31, %36 : vector<8x128xf32>
    %cst_28 = arith.constant dense<0.000000e+00> : vector<8xf32>
    %38 = vector.multi_reduction <add>, %37, %cst_28 [1] : vector<8x128xf32> to vector<8xf32>
    %39 = vector.shape_cast %38 : vector<8xf32> to vector<8x1xf32>
    %cst_29 = arith.constant 6.250000e-02 : f32
    %40 = vector.broadcast %cst_29 : f32 to vector<8x1xf32>
    %41 = arith.mulf %39, %40 : vector<8x1xf32>
    %42 = vector.broadcast %41 : vector<8x1xf32> to vector<8x128xf32>
    %43 = arith.subf %31, %42 : vector<8x128xf32>
    %44 = vector.broadcast %35 : vector<1x128xf32> to vector<8x128xf32>
    %45 = arith.mulf %43, %44 : vector<8x128xf32>
    %46 = arith.mulf %45, %45 : vector<8x128xf32>
    %cst_30 = arith.constant dense<0.000000e+00> : vector<8xf32>
    %47 = vector.multi_reduction <add>, %46, %cst_30 [1] : vector<8x128xf32> to vector<8xf32>
    %48 = vector.shape_cast %47 : vector<8xf32> to vector<8x1xf32>
    %cst_31 = arith.constant 6.250000e-02 : f32
    %49 = vector.broadcast %cst_31 : f32 to vector<8x1xf32>
    %50 = arith.mulf %48, %49 : vector<8x1xf32>
    %51 = vector.broadcast %41 : vector<8x1xf32> to vector<8x128xf32>
    %52 = arith.subf %31, %51 : vector<8x128xf32>
    %cst_32 = arith.constant 9.99999974E-6 : f32
    %53 = vector.broadcast %cst_32 : f32 to vector<8x1xf32>
    %54 = arith.addf %50, %53 : vector<8x1xf32>
    %55 = math.rsqrt %54 : vector<8x1xf32>
    %56 = vector.broadcast %55 : vector<8x1xf32> to vector<8x128xf32>
    %57 = arith.mulf %52, %56 : vector<8x128xf32>
    %c0_33 = arith.constant 0 : index
    %c0_34 = arith.constant 0 : index
    %58 = vector.load %arg5[%c0_33, %c0_34] : memref<12x8xbf16, #tpu.memory_space<vmem>>, vector<12x8xbf16>
    %59 = arith.truncf %57 : vector<8x128xf32> to vector<8x128xbf16>
    %cst_35 = arith.constant dense<0.000000e+00> : vector<12x128xf32>
    %60 = tpu.matmul %58, %59, %cst_35 {dimension_numbers = #tpu.dot_dimension_numbers<[1], [0], [0], [1], [0, 0, 1, 1], [], []>} : vector<12x8xbf16>, vector<8x128xbf16>, vector<12x128xf32> -> vector<12x128xf32>
    %c0_36 = arith.constant 0 : index
    %c0_37 = arith.constant 0 : index
    %61 = vector.load %arg6[%c0_36, %c0_37] : memref<12x1xf32, #tpu.memory_space<vmem>>, vector<12x1xf32>
    %62 = vector.broadcast %61 : vector<12x1xf32> to vector<12x128xf32>
    %63 = arith.addf %60, %62 : vector<12x128xf32>
    %c0_38 = arith.constant 0 : index
    %c0_39 = arith.constant 0 : index
    %64 = vector.load %arg13[%c0_38, %c0_39] : memref<12x128xf32, #tpu.memory_space<vmem>>, vector<12x128xf32>
    tpu.vector_store %arg13[%c0_38, %c0_39], %63 {strides = array<i32>} : memref<12x128xf32, #tpu.memory_space<vmem>>, vector<12x128xf32>,
    %c0_40 = arith.constant 0 : index
    %c0_41 = arith.constant 0 : index
    %65 = vector.load %arg13[%c0_40, %c0_41] : memref<12x128xf32, #tpu.memory_space<vmem>>, vector<4x128xf32>
    %66 = arith.truncf %65 : vector<4x128xf32> to vector<4x128xbf16>
    %cst_42 = arith.constant -1.000000e+30 : f32
    %67 = vector.broadcast %cst_42 : f32 to vector<128x1xf32>
    %c0_43 = arith.constant 0 : index
    %c0_44 = arith.constant 0 : index
    %68 = vector.load %arg14[%c0_43, %c0_44] : memref<128x1xf32, #tpu.memory_space<vmem>>, vector<128x1xf32>
    tpu.vector_store %arg14[%c0_43, %c0_44], %67 {strides = array<i32>} : memref<128x1xf32, #tpu.memory_space<vmem>>, vector<128x1xf32>,
    %cst_45 = arith.constant 0.000000e+00 : f32
    %69 = vector.broadcast %cst_45 : f32 to vector<128x1xf32>
    %c0_46 = arith.constant 0 : index
    %c0_47 = arith.constant 0 : index
    %70 = vector.load %arg15[%c0_46, %c0_47] : memref<128x1xf32, #tpu.memory_space<vmem>>, vector<128x1xf32>
    tpu.vector_store %arg15[%c0_46, %c0_47], %69 {strides = array<i32>} : memref<128x1xf32, #tpu.memory_space<vmem>>, vector<128x1xf32>,
    %cst_48 = arith.constant 0.000000e+00 : f32
    %71 = vector.broadcast %cst_48 : f32 to vector<128x4xf32>
    %c0_49 = arith.constant 0 : index
    %c0_50 = arith.constant 0 : index
    %72 = vector.load %arg16[%c0_49, %c0_50] : memref<128x4xf32, #tpu.memory_space<vmem>>, vector<128x4xf32>
    tpu.vector_store %arg16[%c0_49, %c0_50], %71 {strides = array<i32>} : memref<128x4xf32, #tpu.memory_space<vmem>>, vector<128x4xf32>,
    %c0_i32 = arith.constant 0 : i32
    %c1_i32 = arith.constant 1 : i32
    %73 = arith.muli %c0_i32, %c1_i32 : i32
    %c0_i32_51 = arith.constant 0 : i32
    %74 = arith.addi %c0_i32_51, %73 : i32
    %c128_i32 = arith.constant 128 : i32
    %75 = arith.muli %74, %c128_i32 : i32
    %76 = tpu.assume_multiple %75, 128 : i32
    %c4_52 = arith.constant 4 : index
    %77 = arith.index_cast %76 : i32 to index
    %78 = vector.load %arg13[%c4_52, %77] : memref<12x128xf32, #tpu.memory_space<vmem>>, vector<4x128xf32>
    %79 = arith.truncf %78 : vector<4x128xf32> to vector<4x128xbf16>
    %c8 = arith.constant 8 : index
    %80 = arith.index_cast %76 : i32 to index
    %81 = vector.load %arg13[%c8, %80] : memref<12x128xf32, #tpu.memory_space<vmem>>, vector<4x128xf32>
    %82 = arith.truncf %81 : vector<4x128xf32> to vector<4x128xbf16>
    %c0_53 = arith.constant 0 : index
    %c0_54 = arith.constant 0 : index
    %83 = arith.index_cast %76 : i32 to index
    %84 = vector.load %arg2[%c0_53, %c0_54, %83] : memref<1x1x128xf32, #tpu.memory_space<vmem>>, vector<1x1x128xf32>
    %85 = vector.shape_cast %84 : vector<1x1x128xf32> to vector<1x128xf32>
    %86 = tpu.iota {dimensions = array<i32: 1>} : vector<1x128xi32>
    %87 = vector.broadcast %76 : i32 to vector<1x128xi32>
    %88 = arith.addi %87, %86 : vector<1x128xi32>
    %c16_i32_55 = arith.constant 16 : i32
    %89 = vector.broadcast %c16_i32_55 : i32 to vector<1x128xi32>
    %90 = arith.cmpi slt, %88, %89 : vector<1x128xi32>
    %cst_56 = arith.constant 9.99999997E-7 : f32
    %91 = vector.broadcast %cst_56 : f32 to vector<1x128xf32>
    %92 = arith.addf %85, %91 : vector<1x128xf32>
    %93 = math.log %92 : vector<1x128xf32>
    %cst_57 = arith.constant -1.000000e+30 : f32
    %94 = vector.broadcast %cst_57 : f32 to vector<1x128xf32>
    %95 = arith.select %90, %93, %94 : vector<1x128xi1>, vector<1x128xf32>
    %cst_58 = arith.constant dense<0.000000e+00> : vector<128x128xf32>
    %96 = tpu.matmul %66, %79, %cst_58 {dimension_numbers = #tpu.dot_dimension_numbers<[0], [0], [1], [1], [0, 1, 1, 1], [], []>} : vector<4x128xbf16>, vector<4x128xbf16>, vector<128x128xf32> -> vector<128x128xf32>
    %cst_59 = arith.constant 5.000000e-01 : f32
    %97 = vector.broadcast %cst_59 : f32 to vector<128x128xf32>
    %98 = arith.mulf %96, %97 : vector<128x128xf32>
    %99 = vector.broadcast %95 : vector<1x128xf32> to vector<128x128xf32>
    %100 = arith.addf %98, %99 : vector<128x128xf32>
    %c0_60 = arith.constant 0 : index
    %c0_61 = arith.constant 0 : index
    %101 = vector.load %arg14[%c0_60, %c0_61] : memref<128x1xf32, #tpu.memory_space<vmem>>, vector<128x1xf32>
    %cst_62 = arith.constant dense<0xFF800000> : vector<128xf32>
    %102 = vector.multi_reduction <maximumf>, %100, %cst_62 [1] : vector<128x128xf32> to vector<128xf32>
    %103 = vector.shape_cast %102 : vector<128xf32> to vector<128x1xf32>
    %104 = arith.maximumf %101, %103 : vector<128x1xf32>
    %105 = arith.subf %101, %104 : vector<128x1xf32>
    %106 = math.exp %105 : vector<128x1xf32>
    %107 = vector.broadcast %104 : vector<128x1xf32> to vector<128x128xf32>
    %108 = arith.subf %100, %107 : vector<128x128xf32>
    %109 = math.exp %108 : vector<128x128xf32>
    %c0_63 = arith.constant 0 : index
    %c0_64 = arith.constant 0 : index
    %110 = vector.load %arg15[%c0_63, %c0_64] : memref<128x1xf32, #tpu.memory_space<vmem>>, vector<128x1xf32>
    %111 = arith.mulf %110, %106 : vector<128x1xf32>
    %cst_65 = arith.constant dense<0.000000e+00> : vector<128xf32>
    %112 = vector.multi_reduction <add>, %109, %cst_65 [1] : vector<128x128xf32> to vector<128xf32>
    %113 = vector.shape_cast %112 : vector<128xf32> to vector<128x1xf32>
    %114 = arith.addf %111, %113 : vector<128x1xf32>
    %c0_66 = arith.constant 0 : index
    %c0_67 = arith.constant 0 : index
    %115 = vector.load %arg15[%c0_66, %c0_67] : memref<128x1xf32, #tpu.memory_space<vmem>>, vector<128x1xf32>
    tpu.vector_store %arg15[%c0_66, %c0_67], %114 {strides = array<i32>} : memref<128x1xf32, #tpu.memory_space<vmem>>, vector<128x1xf32>,
    %116 = vector.broadcast %85 : vector<1x128xf32> to vector<128x128xf32>
    %117 = arith.mulf %109, %116 : vector<128x128xf32>
    %118 = arith.truncf %117 : vector<128x128xf32> to vector<128x128xbf16>
    %cst_68 = arith.constant dense<0.000000e+00> : vector<128x4xf32>
    %119 = tpu.matmul %118, %82, %cst_68 {dimension_numbers = #tpu.dot_dimension_numbers<[1], [1], [0], [0], [0, 0, 1, 0], [], []>} : vector<128x128xbf16>, vector<4x128xbf16>, vector<128x4xf32> -> vector<128x4xf32>
    %c0_69 = arith.constant 0 : index
    %c0_70 = arith.constant 0 : index
    %120 = vector.load %arg16[%c0_69, %c0_70] : memref<128x4xf32, #tpu.memory_space<vmem>>, vector<128x4xf32>
    %121 = vector.broadcast %106 : vector<128x1xf32> to vector<128x4xf32>
    %122 = arith.mulf %120, %121 : vector<128x4xf32>
    %123 = arith.addf %122, %119 : vector<128x4xf32>
    %c0_71 = arith.constant 0 : index
    %c0_72 = arith.constant 0 : index
    %124 = vector.load %arg16[%c0_71, %c0_72] : memref<128x4xf32, #tpu.memory_space<vmem>>, vector<128x4xf32>
    tpu.vector_store %arg16[%c0_71, %c0_72], %123 {strides = array<i32>} : memref<128x4xf32, #tpu.memory_space<vmem>>, vector<128x4xf32>,
    %c0_73 = arith.constant 0 : index
    %c0_74 = arith.constant 0 : index
    %125 = vector.load %arg14[%c0_73, %c0_74] : memref<128x1xf32, #tpu.memory_space<vmem>>, vector<128x1xf32>
    tpu.vector_store %arg14[%c0_73, %c0_74], %104 {strides = array<i32>} : memref<128x1xf32, #tpu.memory_space<vmem>>, vector<128x1xf32>,
    %c1_i32_75 = arith.constant 1 : i32
    %c0_76 = arith.constant 0 : index
    %c0_77 = arith.constant 0 : index
    %126 = vector.load %arg16[%c0_76, %c0_77] : memref<128x4xf32, #tpu.memory_space<vmem>>, vector<128x4xf32>
    %c0_78 = arith.constant 0 : index
    %c0_79 = arith.constant 0 : index
    %127 = vector.load %arg15[%c0_78, %c0_79] : memref<128x1xf32, #tpu.memory_space<vmem>>, vector<128x1xf32>
    %128 = tpu.reciprocal %127 {approx = true} : vector<128x1xf32> -> vector<128x1xf32>
    %129 = vector.broadcast %128 : vector<128x1xf32> to vector<128x4xf32>
    %130 = arith.mulf %126, %129 : vector<128x4xf32>
    %c0_80 = arith.constant 0 : index
    %c0_81 = arith.constant 0 : index
    %131 = vector.load %arg7[%c0_80, %c0_81] : memref<8x4xf32, #tpu.memory_space<vmem>>, vector<8x4xf32>
    %cst_82 = arith.constant 0.000000e+00 : f32
    %132 = vector.broadcast %cst_82 : f32 to vector<128x4xf32>
    %133 = arith.maximumf %130, %132 : vector<128x4xf32>
    %cst_83 = arith.constant dense<0.000000e+00> : vector<8x128xf32>
    %134 = tpu.matmul %131, %133, %cst_83 {dimension_numbers = #tpu.dot_dimension_numbers<[1], [1], [0], [0], [0, 0, 1, 0], [], []>} : vector<8x4xf32>, vector<128x4xf32>, vector<8x128xf32> -> vector<8x128xf32>
    %c0_84 = arith.constant 0 : index
    %c0_85 = arith.constant 0 : index
    %135 = vector.load %arg8[%c0_84, %c0_85] : memref<8x1xf32, #tpu.memory_space<vmem>>, vector<8x1xf32>
    %136 = vector.broadcast %135 : vector<8x1xf32> to vector<8x128xf32>
    %137 = arith.addf %134, %136 : vector<8x128xf32>
    %138 = vector.broadcast %3 : vector<1x128xf32> to vector<8x128xf32>
    %139 = arith.mulf %137, %138 : vector<8x128xf32>
    %cst_86 = arith.constant 1.000000e+00 : f32
    %140 = vector.broadcast %cst_86 : f32 to vector<8x128xf32>
    %141 = arith.mulf %140, %139 : vector<8x128xf32>
    %142 = arith.addf %141, %31 : vector<8x128xf32>
    %c0_87 = arith.constant 0 : index
    %c0_88 = arith.constant 0 : index
    %143 = vector.load %arg9[%c0_87, %c0_88] : memref<8x8xf32, #tpu.memory_space<vmem>>, vector<8x8xf32>
    %cst_89 = arith.constant dense<0.000000e+00> : vector<8x128xf32>
    %144 = tpu.matmul %143, %142, %cst_89 {dimension_numbers = #tpu.dot_dimension_numbers<[1], [0], [0], [1], [0, 0, 1, 1], [], []>} : vector<8x8xf32>, vector<8x128xf32>, vector<8x128xf32> -> vector<8x128xf32>
    %c0_90 = arith.constant 0 : index
    %c0_91 = arith.constant 0 : index
    %145 = vector.load %arg10[%c0_90, %c0_91] : memref<8x1xf32, #tpu.memory_space<vmem>>, vector<8x1xf32>
    %146 = vector.broadcast %145 : vector<8x1xf32> to vector<8x128xf32>
    %147 = arith.addf %144, %146 : vector<8x128xf32>
    %148 = arith.addf %1, %147 : vector<8x128xf32>
    %149 = vector.broadcast %3 : vector<1x128xf32> to vector<8x128xf32>
    %150 = arith.mulf %148, %149 : vector<8x128xf32>
    %c0_92 = arith.constant 0 : index
    %c0_93 = arith.constant 0 : index
    %c0_94 = arith.constant 0 : index
    %151 = vector.load %arg11[%c0_92, %c0_93, %c0_94] : memref<1x8x128xf32, #tpu.memory_space<vmem>>, vector<1x8x128xf32>
    %152 = vector.shape_cast %151 : vector<1x8x128xf32> to vector<8x128xf32>
    %153 = vector.shape_cast %150 : vector<8x128xf32> to vector<1x8x128xf32>
    tpu.vector_store %arg11[%c0_92, %c0_93, %c0_94], %153 {strides = array<i32>} : memref<1x8x128xf32, #tpu.memory_space<vmem>>, vector<1x8x128xf32>,
    return
  }
  func.func @transform_0(%arg0: i32) -> (i32, i32, i32) {
    %c0_i32 = arith.constant 0 : i32
    %c0_i32_0 = arith.constant 0 : i32
    %c0_i32_1 = arith.constant 0 : i32
    return %arg0, %c0_i32, %c0_i32_0 : i32, i32, i32
  }
  func.func @transform_1(%arg0: i32) -> (i32, i32, i32) {
    %c0_i32 = arith.constant 0 : i32
    %c0_i32_0 = arith.constant 0 : i32
    %c0_i32_1 = arith.constant 0 : i32
    return %arg0, %c0_i32, %c0_i32_0 : i32, i32, i32
  }
  func.func @transform_2(%arg0: i32) -> (i32, i32, i32) {
    %c0_i32 = arith.constant 0 : i32
    %c0_i32_0 = arith.constant 0 : i32
    %c0_i32_1 = arith.constant 0 : i32
    %c0_i32_2 = arith.constant 0 : i32
    return %c0_i32, %c0_i32_0, %c0_i32_1 : i32, i32, i32
  }
  func.func @transform_3(%arg0: i32) -> (i32, i32) {
    %c0_i32 = arith.constant 0 : i32
    %c0_i32_0 = arith.constant 0 : i32
    %c0_i32_1 = arith.constant 0 : i32
    return %c0_i32, %c0_i32_0 : i32, i32
  }
  func.func @transform_4(%arg0: i32) -> (i32, i32) {
    %c0_i32 = arith.constant 0 : i32
    %c0_i32_0 = arith.constant 0 : i32
    %c0_i32_1 = arith.constant 0 : i32
    return %c0_i32, %c0_i32_0 : i32, i32
  }
  func.func @transform_5(%arg0: i32) -> (i32, i32) {
    %c0_i32 = arith.constant 0 : i32
    %c0_i32_0 = arith.constant 0 : i32
    %c0_i32_1 = arith.constant 0 : i32
    return %c0_i32, %c0_i32_0 : i32, i32
  }
  func.func @transform_6(%arg0: i32) -> (i32, i32) {
    %c0_i32 = arith.constant 0 : i32
    %c0_i32_0 = arith.constant 0 : i32
    %c0_i32_1 = arith.constant 0 : i32
    return %c0_i32, %c0_i32_0 : i32, i32
  }
  func.func @transform_7(%arg0: i32) -> (i32, i32) {
    %c0_i32 = arith.constant 0 : i32
    %c0_i32_0 = arith.constant 0 : i32
    %c0_i32_1 = arith.constant 0 : i32
    return %c0_i32, %c0_i32_0 : i32, i32
  }
  func.func @transform_8(%arg0: i32) -> (i32, i32) {
    %c0_i32 = arith.constant 0 : i32
    %c0_i32_0 = arith.constant 0 : i32
    %c0_i32_1 = arith.constant 0 : i32
    return %c0_i32, %c0_i32_0 : i32, i32
  }
  func.func @transform_9(%arg0: i32) -> (i32, i32) {
    %c0_i32 = arith.constant 0 : i32
    %c0_i32_0 = arith.constant 0 : i32
    %c0_i32_1 = arith.constant 0 : i32
    return %c0_i32, %c0_i32_0 : i32, i32
  }
  func.func @transform_10(%arg0: i32) -> (i32, i32, i32) {
    %c0_i32 = arith.constant 0 : i32
    %c0_i32_0 = arith.constant 0 : i32
    %c0_i32_1 = arith.constant 0 : i32
    return %arg0, %c0_i32, %c0_i32_0 : i32, i32, i32
  }
}

</mosaic_0001>

<bundles_post_ra>
// kernel: att_module_forward.1
= control target key start
LH: loop header
LB: loop body
LE: loop exit
PB: predicated region body
PF: predicated region fallthrough
CT: control target
= control target key end

     0   :  { %15 = vsyncpa [#allocation8], 0  ;;  %s3188_s0 = inlined_call_operand.vmem [shape: f32[2,8,128], index: 0, kind: input, shape index: {}]   ;;  %s3189_s1 = inlined_call_operand.vmem [shape: f32[2,1,128], index: 1, kind: input, shape index: {}]   ;;  %s3190_s2 = inlined_call_operand.vmem [shape: bf16[3,8,8], index: 2, kind: input, shape index: {}]   ;;  %s3191_s3 = inlined_call_operand.vmem [shape: f32[8,1], index: 3, kind: input, shape index: {}]   ;;  %s3192_s4 = inlined_call_operand.vmem [shape: bf16[12,8], index: 4, kind: input, shape index: {}]   ;;  %s3193_s5 = inlined_call_operand.vmem [shape: f32[12,1], index: 5, kind: input, shape index: {}]   ;;  %s3194_s6 = inlined_call_operand.vmem [shape: f32[8,4], index: 6, kind: input, shape index: {}]   ;;  %s3195_s7 = inlined_call_operand.vmem [shape: f32[8,1], index: 7, kind: input, shape index: {}]   ;;  %s3196_s8 = inlined_call_operand.vmem [shape: f32[8,8], index: 8, kind: input, shape index: {}]   ;;  %s3197_s9 = inlined_call_operand.vmem [shape: f32[8,1], index: 9, kind: input, shape index: {}]   ;;  %s3198_s10 = inlined_call_operand.hbm [shape: f32[2,8,128], index: 10, kind: output, shape index: {}]  }
   0x1   :  { %17 = vsyncpa [#allocation8 + $0x1], 0  ;;  %s2481_s13 = smov 0   ;;  %s2483_s14 = smov 0  }
   0x2   :  { %s2485_s15 = smov 0   ;;  %s2487_s16 = smov 0  }
   0x3 LB: > { %s2502_s17 = sadd.s32 4294967295, %s2415_s16   ;;  %s1970_s18 = sadd.s32 4294967294, %s2415_s16   ;;  %s2415_s16 = sphi %s2487_s16, %s3226_s16   ;;  %s2411_s15 = sphi %s2485_s15, %s3225_s15   ;;  %s2407_s14 = sphi %s2483_s14, %s3224_s14   ;;  %s2403_s13 = sphi %s2481_s13, %s3223_s13  }
   0x4   : > { %s2506_s19 = sadd.s32 1, %s2415_s16   ;;  %s250_s20 = sadd.s32 1, %s2411_s15 }
   0x5   : > { %s247_s21 = ssub.s32 %s2415_s16, %s2506_s19  ;;  %p260_p0 = scmp.ne.s32.totalorder %s2411_s15, %s2407_s14 }
   0x6   : > { %p248_p1 = scmp.eq.s32.totalorder %s247_s21, 0  ;;  %p261_p2 = scmp.eq.s32.totalorder %s2502_s17, 1 }
   0x7   : > { %p266_p3 = scmp.ne.s32.totalorder %s2407_s14, %s2403_s13  ;;  %p267_p4 = scmp.eq.s32.totalorder %s1970_s18, 1 }
   0x8   : > { %s2517_s22 = scalar_select %p248_p1, %s2411_s15, %s250_s20  }
   0x9   : > { %p2519_p5 = por %p261_p2, %p260_p0  ;;  %p2523_p6 = por %p267_p4, %p266_p3 }
   0xa   : > { %p1973_p7 = scmp.ge.s32.totalorder %s2415_s16, 1  ;;  %p322_p8 = scmp.lt.s32.totalorder %s2415_s16, 3 }
   0xc   : > { %p323_p9 = pnand %p1973_p7, %p322_p8 }
   0xd   : > { %p362_p10 = scmp.lt.s32.totalorder (!%p323_p9), %s2502_s17, 1  ;;  %vm374_vm0 = vcmask (!%p323_p9), 15360   ;;  %vm376_vm1 = vcmask (!%p323_p9), 31760   ;;  %v3199_v0 = vmov (!%p323_p9), 0.0   ;;  %s2418_s30 = smov (!%p323_p9), 2   ;;  %vm2419_vm2 = vmmov (!%p323_p9), 0  }
   0xe   : > { %326 = sbr.rel (%p323_p9) target bundleno = 2508 (0x9cc), region = 60  ;;  %375 = vst.msk [vmem:[#allocation2] sm:$0xff] (!%p323_p9), %vm374_vm0, %v3199_v0  ;;  %2060 = vmatprep.subr.bf16.mxu0 (!%p323_p9), %v3199_v0  ;;  %2062 = vmatprep.mubr.msk.bf16.mxu0 (!%p323_p9), %vm2419_vm2, %v3199_v0  ;;  %vm382_vm3 = vcmask (!%p323_p9), 1047568   ;;  %vm398_vm4 = vcmask (!%p323_p9), 1043456   ;;  %s2420_s11 = smov (!%p323_p9), 126   ;;  %vm394_vm5 = vcmask (!%p323_p9), 64512   ;;  %v372_v23 = vlaneseq (!%p323_p9) }
   0xf   : > { %377 = vst.msk [vmem:[#allocation2 + $0x8] sm:$0xff] (!%p323_p9), %vm376_vm1, %v3199_v0  ;;  %v393_v8 = vld [vmem:[%s3190_s2] sm:$0xf] (!%p323_p9)  ;;  %s2421_s20 = smov (!%p323_p9), 124   ;;  %v2422_v9 = vmov (!%p323_p9), 0   ;;  %vm455_vm6 = vcmask (!%p323_p9), 1031168  }
  0x10   : > { %2249 = vset.pattern.permute.xlu1 (!%p323_p9), %v2422_v9  ;;  %v385_v10 = vld [vmem:[%s3191_s3] sm:$0xff] (!%p323_p9)  ;;  %2250 = vset.pattern.permute.xlu0 (!%p323_p9), %v2422_v9  ;;  %vm510_vm7 = vcmask (!%p323_p9), 1014784   ;;  %v1979_v20 = vld [vmem:[%s3190_s2 + $0x8] sm:$0xf] (!%p323_p9)  ;;  %v373_v25 = vand.u32 (!%p323_p9), 127, %v372_v23  ;;  %v2584_v27 = vshrl.u32 (!%p323_p9), %v372_v23, 7 }
  0x11   : > { %v1977_v15 = vld [vmem:[%s3190_s2 + $0x4] sm:$0xf] (!%p323_p9)  ;;  %vm680_vm9 = vcmask (!%p323_p9), 31744   ;;  %vm749_vm10 = vcmask (!%p323_p9), 1041408   ;;  %vm647_vm11 = vcmask (!%p323_p9), 7168  }
  0x12   : > { %vm560_vm8 = vcmp.lt.s32.totalorder (!%p323_p9), %v373_v25, 16  ;;  %v3200_v29 = vsub.s32 (!%p323_p9), 0, %v2584_v27  ;;  %v579_v45 = vld [vmem:[%s3193_s5] sm:$0xff] (!%p323_p9)  ;;  %681 = vst.msk [vmem:[#allocation6] sm:$0xff] (!%p323_p9), %vm680_vm9, %v3199_v0  ;;  %682 = vst.msk [vmem:[#allocation6 + $0x8] sm:$0xff] (!%p323_p9), %vm680_vm9, %v3199_v0 }
  0x13   : > { %v1981_v36 = vsel (!%p323_p9), %vm560_vm8, 1.0, %v3199_v0  ;;  %v2251_v53 = vld [vmem:[%s3192_s4] sm:$0x3f] (!%p323_p9)   ;;  %683 = vst.msk [vmem:[#allocation6 + $0x10] sm:$0xff] (!%p323_p9), %vm680_vm9, %v3199_v0  ;;  %684 = vst.msk [vmem:[#allocation6 + $0x18] sm:$0xff] (!%p323_p9), %vm680_vm9, %v3199_v0 }
  0x14   : > { %685 = vst.msk [vmem:[#allocation6 + $0x20] sm:$0xff] (!%p323_p9), %vm680_vm9, %v3199_v0  ;;  %686 = vst.msk [vmem:[#allocation6 + $0x28] sm:$0xff] (!%p323_p9), %vm680_vm9, %v3199_v0 }
  0x15   : > { %s2535_s25 = scalar_select %p362_p10, %s2502_s17, 1  ;;  %687 = vst.msk [vmem:[#allocation6 + $0x30] sm:$0xff] %vm680_vm9, %v3199_v0  ;;  %688 = vst.msk [vmem:[#allocation6 + $0x38] sm:$0xff] %vm680_vm9, %v3199_v0 }
  0x16   : > { %689 = vst.msk [vmem:[#allocation6 + $0x40] sm:$0xff] %vm680_vm9, %v3199_v0  ;;  %690 = vst.msk [vmem:[#allocation6 + $0x48] sm:$0xff] %vm680_vm9, %v3199_v0 }
  0x17   : > { %s1975_s26 = sshll.u32 %s2535_s25, 3  ;;  %691 = vst.msk [vmem:[#allocation6 + $0x50] sm:$0xff] %vm680_vm9, %v3199_v0  ;;  %692 = vst.msk [vmem:[#allocation6 + $0x58] sm:$0xff] %vm680_vm9, %v3199_v0 }
  0x18   : > { %s2541_s29 = scalar_lea.vmem %s3188_s0, %s1975_s26  ;;  %693 = vst.msk [vmem:[#allocation6 + $0x60] sm:$0xff] %vm680_vm9, %v3199_v0  ;;  %694 = vst.msk [vmem:[#allocation6 + $0x68] sm:$0xff] %vm680_vm9, %v3199_v0 }
  0x19   : > { %v370_v1 = vld [vmem:[%s2541_s29] sm:$0xff]  ;;  %695 = vst.msk [vmem:[#allocation6 + $0x70] sm:$0xff] %vm680_vm9, %v3199_v0  ;;  %696 = vst.msk [vmem:[#allocation6 + $0x78] sm:$0xff] %vm680_vm9, %v3199_v0 }
  0x1a   : > { %379 = vrot.lane.b32.xlu0 %v370_v1, %s2418_s30  ;;  %664 = vst.msk [vmem:[#allocation5] sm:$0xff] %vm647_vm11, %v3199_v0  ;;  %665 = vst.msk [vmem:[#allocation5 + $0x8] sm:$0xff] %vm647_vm11, %v3199_v0  ;;  %s359_s30 = sand.u32 1, %s2407_s14  }
  0x1b   : > { %666 = vst.msk [vmem:[#allocation5 + $0x10] sm:$0xff] %vm647_vm11, %v3199_v0  ;;  %667 = vst.msk [vmem:[#allocation5 + $0x18] sm:$0xff] %vm647_vm11, %v3199_v0  ;;  %s1889_s27 = scalar_lea.sflag [#allocation8], %s359_s30 }
  0x1c   : > { %668 = vst.msk [vmem:[#allocation5 + $0x20] sm:$0xff] %vm647_vm11, %v3199_v0  ;;  %669 = vst.msk [vmem:[#allocation5 + $0x28] sm:$0xff] %vm647_vm11, %v3199_v0 }
  0x1d   : > { %670 = vst.msk [vmem:[#allocation5 + $0x30] sm:$0xff] %vm647_vm11, %v3199_v0  ;;  %671 = vst.msk [vmem:[#allocation5 + $0x38] sm:$0xff] %vm647_vm11, %v3199_v0 }
  0x1e   : > { %672 = vst.msk [vmem:[#allocation5 + $0x40] sm:$0xff] %vm647_vm11, %v3199_v0  ;;  %673 = vst.msk [vmem:[#allocation5 + $0x48] sm:$0xff] %vm647_vm11, %v3199_v0 }
  0x1f   : > { %674 = vst.msk [vmem:[#allocation5 + $0x50] sm:$0xff] %vm647_vm11, %v3199_v0  ;;  %675 = vst.msk [vmem:[#allocation5 + $0x58] sm:$0xff] %vm647_vm11, %v3199_v0 }
  0x20   : > { %676 = vst.msk [vmem:[#allocation5 + $0x60] sm:$0xff] %vm647_vm11, %v3199_v0  ;;  %677 = vst.msk [vmem:[#allocation5 + $0x68] sm:$0xff] %vm647_vm11, %v3199_v0 }
  0x21   : > { %678 = vst.msk [vmem:[#allocation5 + $0x70] sm:$0xff] %vm647_vm11, %v3199_v0  ;;  %679 = vst.msk [vmem:[#allocation5 + $0x78] sm:$0xff] %vm647_vm11, %v3199_v0 }
  0x22   : > { %vm3073_vm12 = vmpackc.low %vm680_vm9, %vm680_vm9 }
  0x8c   : > { %v380_v2 = vpop.permute.xlu0 %379 }
  0x8d   : > { %383 = vst.msk [vmem:[#allocation2] sm:$0xff] %vm382_vm3, %v380_v2 }
  0x8e   : > { %384 = vst.msk [vmem:[#allocation2 + $0x8] sm:$0xff] %vm374_vm0, %v380_v2 }
  0x94   : > { %v443_v4 = vld [vmem:[#allocation2] sm:$0xff] }
  0x95   : > { %v444_v3 = vld [vmem:[#allocation2 + $0x8] sm:$0xff]  ;;  %v445_v6 = vpack.c.bf16 %v443_v4, %v443_v4 }
  0x96   : > { %v446_v5 = vpack.c.bf16 %v444_v3, %v444_v3 }
  0x97   : > { %451 = vrot.lane.b32.xlu0 %v445_v6, %s2420_s11  ;;  %v400_v7 = vsel %vm398_vm4, %v445_v6, 0 }
  0x98   : > { %453 = vrot.lane.b32.xlu1 %v446_v5, %s2420_s11  ;;  %2061 = vmatpush3.bf16.msra.mxu0 %v400_v7  ;;  %s1974_s11 = sshll.u32 %s359_s30, 3 }
  0x99   : > { %2066 = vmatprep.subr.bf16.mxu0 %v3199_v0  ;;  %s361_s12 = scalar_lea.vmem [#allocation7], %s1974_s11 }
  0x9a   : > { %s1902_s18 = sshll.u32 %s361_s12, 4  ;;  %s3148_s18 = int_to_ptr.vmem [resolvable:$true] %s1902_s18 }
  0x9b   : > { %508 = vrot.lane.b32.xlu0 %v446_v5, %s2421_s20  ;;  %2063 = vmatmul.mubr.msk.bf16.vlgmr.msra.gmra.mrb[0].mxu0 %vm394_vm5, %v393_v8  ;;  %s2353_s28 = scalar_lea.vmem %s3148_s18, 128 }
  0x9c   : > { %506 = vrot.lane.b32.xlu1 %v445_v6, %s2421_s20  ;;  %2068 = vmatprep.mubr.msk.bf16.mxu0 %vm2419_vm2, %v3199_v0  ;;  %s2578_s20 = scalar_lea.vmem %s3189_s1, %s2535_s25  ;;  %p2354_p11 = scmp.ne.s32.totalorder %s3148_s18, %s2353_s28 }
  0x9d   : > { %v2581_v21 = vld [vmem:[%s2578_s20] sm:$0x1] }
  0x9e   : > { %v705_v22 = vadd.f32 1e-06, %v2581_v21  ;;  %p2355_p12 = pnand %p2354_p11, %p2519_p5 }
  0xa0   : > { %388 = vperm.xlu1 %2249, %v385_v10   ;;  %2252 = vlog2.f32 %v705_v22  ;;  %v2423_v10 = vmov -1e+30   ;;  %p2356_p13 = pneg %p2355_p12 }
  0xa1   : > { %648 = vst.msk [vmem:[#allocation4] sm:$0xff] %vm647_vm11, %v2423_v10  ;;  %649 = vst.msk [vmem:[#allocation4 + $0x8] sm:$0xff] %vm647_vm11, %v2423_v10 }
  0xa2   : > { %650 = vst.msk [vmem:[#allocation4 + $0x10] sm:$0xff] %vm647_vm11, %v2423_v10  ;;  %651 = vst.msk [vmem:[#allocation4 + $0x18] sm:$0xff] %vm647_vm11, %v2423_v10 }
  0xa3   : > { %652 = vst.msk [vmem:[#allocation4 + $0x20] sm:$0xff] %vm647_vm11, %v2423_v10  ;;  %653 = vst.msk [vmem:[#allocation4 + $0x28] sm:$0xff] %vm647_vm11, %v2423_v10 }
  0xa4   : > { %654 = vst.msk [vmem:[#allocation4 + $0x30] sm:$0xff] %vm647_vm11, %v2423_v10  ;;  %655 = vst.msk [vmem:[#allocation4 + $0x38] sm:$0xff] %vm647_vm11, %v2423_v10 }
  0xa5   : > { %656 = vst.msk [vmem:[#allocation4 + $0x40] sm:$0xff] %vm647_vm11, %v2423_v10  ;;  %657 = vst.msk [vmem:[#allocation4 + $0x48] sm:$0xff] %vm647_vm11, %v2423_v10 }
  0xa6   : > { %658 = vst.msk [vmem:[#allocation4 + $0x50] sm:$0xff] %vm647_vm11, %v2423_v10  ;;  %659 = vst.msk [vmem:[#allocation4 + $0x58] sm:$0xff] %vm647_vm11, %v2423_v10 }
  0xa7   : > { %660 = vst.msk [vmem:[#allocation4 + $0x60] sm:$0xff] %vm647_vm11, %v2423_v10  ;;  %661 = vst.msk [vmem:[#allocation4 + $0x68] sm:$0xff] %vm647_vm11, %v2423_v10 }
  0xa8   : > { %662 = vst.msk [vmem:[#allocation4 + $0x70] sm:$0xff] %vm647_vm11, %v2423_v10  ;;  %663 = vst.msk [vmem:[#allocation4 + $0x78] sm:$0xff] %vm647_vm11, %v2423_v10 }
  0xaa   : > { %v2253_v24 = vpop.eup %2252 }
  0xab   : > { %v707_v26 = vmul.f32 0.6931472, %v2253_v24 }
  0xad   : > { %v708_v28 = vsel %vm560_vm8, %v707_v26, -1e+30 }
  0xae   : > { %v2589_v30 = vrot.slane %v708_v28, %v3200_v29 }
 0x109   : > { %v452_v12 = vpop.permute.xlu0 %451 }
 0x10a   : > { %v454_v11 = vpop.permute.xlu1 %453 }
 0x10b   : > { %v456_v13 = vsel %vm455_vm6, %v452_v12, %v454_v11 }
 0x10c   : > { %v461_v14 = vsel %vm398_vm4, %v456_v13, 0 }
 0x10d   : > { %2067 = vmatpush3.bf16.msra.mxu0 %v461_v14  ;;  %v509_v17 = vpop.permute.xlu0 %508 }
 0x10e   : > { %v507_v16 = vpop.permute.xlu1 %506  ;;  %2072 = vmatprep.subr.bf16.mxu0 %v3199_v0 }
 0x10f   : > { %v511_v18 = vsel %vm510_vm7, %v507_v16, %v509_v17 }
 0x110   : > { %v516_v19 = vsel %vm398_vm4, %v511_v18, 0  ;;  %2069 = vmatmul.mubr.msk.bf16.vlgmr.msra.gmra.mrb[0].mxu0 %vm394_vm5, %v1977_v15 }
 0x111   : > { %2073 = vmatpush3.bf16.msra.mxu0 %v516_v19  ;;  %2074 = vmatprep.mubr.msk.bf16.mxu0 %vm2419_vm2, %v3199_v0 }
 0x112   : > { %2078 = vmatprep.subr.bf16.mxu0 %v3199_v0 }
 0x11c   : > { %2075 = vmatmul.mubr.msk.bf16.vlgmr.msra.gmra.mrb[0].mxu0 %vm394_vm5, %v1979_v20 }
 0x11d   : > { %2080 = vmatprep.mubr.msk.bf16.mxu0 %vm2419_vm2, %v3199_v0 }
 0x11f   : > { %v389_v31 = vpop.permute.xlu1 %388 }
 0x1ef   : > { %v552_v32 = vpop.f32.mrb[0].mxu0 }
 0x1f0   : > { %v2192_v33 = vadd.f32 %v552_v32, %v389_v31  ;;  %v2076_v34 = vpop.f32.mrb[1].mxu0 }
 0x1f1   : > { %v555_v35 = vpop.f32.mrb[2].mxu0 }
 0x1f2   : > { %v2592_v37 = vmax.f32 %v2192_v33, 0.0  ;;  %v2077_v38 = vpop.f32.mrb[3].mxu0 }
 0x1f4   : > { %v563_v39 = vmul.f32 %v1981_v36, %v2592_v37 }
 0x1f6   : > { %564 = vadd.xlane.f32.xlu0 %v563_v39 }
 0x20c   : > { %583 = vperm.xlu0 %2250, %v579_v45  }
 0x283   : > { %v565_v40 = vpop.xlane.xlu0 %564 }
 0x284   : > { %v566_v41 = vmul.f32 0.0625, %v565_v40 }
 0x286   : > { %v567_v42 = vsub.f32 %v2592_v37, %v566_v41 }
 0x288   : > { %v568_v43 = vmul.f32 %v1981_v36, %v567_v42 }
 0x28a   : > { %v569_v44 = vmul.f32 %v568_v43, %v568_v43 }
 0x28b   : > { %v584_v54 = vpop.permute.xlu0 %583 }
 0x28c   : > { %570 = vadd.xlane.f32.xlu1 %v569_v44 }
 0x319   : > { %v571_v46 = vpop.xlane.xlu1 %570 }
 0x31a   : > { %v572_v47 = vmul.f32 0.0625, %v571_v46 }
 0x31c   : > { %v573_v48 = vadd.f32 1e-05, %v572_v47 }
 0x31e   : > { %2254 = vrsqrt.f32 %v573_v48 }
 0x328   : > { %v2255_v49 = vpop.eup %2254 }
 0x329   : > { %v575_v50 = vmul.f32 %v2255_v49, %v567_v42 }
 0x32b   : > { %v578_v51 = vpack.c.bf16 %v575_v50, %v575_v50 }
 0x32d   : > { %v600_v52 = vsel %vm398_vm4, %v578_v51, 0 }
 0x32e   : > { %2079 = vmatpush3.bf16.msra.mxu0 %v600_v52 }
 0x331   : > { %2081 = vmatmul.mubr.msk.bf16.vlgmr.msra.gmra.mrb[4].mxu0 %vm394_vm5, %v2251_v53 }
 0x404   : > { %v636_v55 = vpop.f32.mrb[4].mxu0 }
 0x405   : > { %v637_v56 = vadd.f32 %v636_v55, %v584_v54  ;;  %v2082_v57 = vpop.f32.mrb[5].mxu0 }
 0x406   : > { %v2636_v58 = vpop.f32.mrb[6].mxu0 }
 0x407   : > { %643 = vst [vmem:[#allocation3] sm:$0xff] %v637_v56  ;;  %v2083_v59 = vpop.f32.mrb[7].mxu0 }
 0x40e   : > { %v697_v60 = vld [vmem:[#allocation3 + $0x4] sm:$0xf]  ;;  %v645_v61 = vld [vmem:[#allocation3] sm:$0xf] }
 0x40f   : > { %v698_v62 = vpack.c.bf16 %v697_v60, %v697_v60  ;;  %v646_v63 = vpack.c.bf16 %v645_v61, %v645_v61 }
 0x411   : > { %2201 = vmatprep.subr.msk.bf16.mxu1 %vm749_vm10, %v698_v62  ;;  %709 = vxpose.xlu1.c.b16.start.end [1/1] (short) %v646_v63, 128  ;;  %v751_v1 = vsel %vm749_vm10, %v698_v62, 0 }
 0x412   : > { %2085 = vmatpush3.bf16.msra.mxu1 %v751_v1 }
 0x477   : > { %v717_v2 = vpop.trf.xlu1 }
 0x478   : > { %2086 = vmatprep.mubr.msk.bf16.mxu1 %vm680_vm9, %v717_v2  ;;  %v580_v2 = vld [vmem:[%s3193_s5 + $0x8] sm:$0xf] }
 0x47b   : > { %v718_v3 = vpop.trf.xlu1 }
 0x47c   : > { %2087 = vmatmul.mubr.msk.bf16.vlgmr.msra.gmra.mrb[0].mxu1 %vm680_vm9, %v718_v3  ;;  %v2763_v3 = vld [vmem:[#allocation4] sm:$0xff] }
 0x47f   : > { %v719_v4 = vpop.trf.xlu1 }
 0x480   : > { %2090 = vmatprep.mubr.msk.bf16.mxu1 %vm680_vm9, %v719_v4 }
 0x483   : > { %v720_v5 = vpop.trf.xlu1 }
 0x484   : > { %2091 = vmatmul.mubr.msk.bf16.gmra.mrb[4].mxu1 %vm680_vm9, %v720_v5 }
 0x487   : > { %v721_v6 = vpop.trf.xlu1 }
 0x488   : > { %2094 = vmatprep.mubr.msk.bf16.mxu1 %vm680_vm9, %v721_v6 }
 0x48b   : > { %v722_v7 = vpop.trf.xlu1 }
 0x48c   : > { %2095 = vmatmul.mubr.msk.bf16.gmra.mrb[8].mxu1 %vm680_vm9, %v722_v7  ;;  %v2770_v7 = vld [vmem:[#allocation4 + $0x10] sm:$0xff] }
 0x48f   : > { %v723_v8 = vpop.trf.xlu1 }
 0x490   : > { %2098 = vmatprep.mubr.msk.bf16.mxu1 %vm680_vm9, %v723_v8 }
 0x493   : > { %v724_v9 = vpop.trf.xlu1 }
 0x494   : > { %2099 = vmatmul.mubr.msk.bf16.gmra.mrb[12].mxu1 %vm680_vm9, %v724_v9 }
 0x495   : > { %2152 = vmatprep.mubr.msk.f32.mxu1 %vm2419_vm2, %v3199_v0 }
 0x54f   : > { %v2088_v11 = vpop.f32.mrb[0].mxu1 }
 0x550   : > { %v852_v12 = vmul.f32 0.5, %v2088_v11  ;;  %v787_v13 = vpop.f32.mrb[1].mxu1 }
 0x551   : > { %v850_v14 = vmul.f32 0.5, %v787_v13  ;;  %v2089_v15 = vpop.f32.mrb[2].mxu1  ;;  %v2787_v13 = vld [vmem:[#allocation4 + $0x18] sm:$0xff] }
 0x552   : > { %v853_v16 = vmul.f32 0.5, %v2089_v15  ;;  %v790_v17 = vpop.f32.mrb[3].mxu1  ;;  %v2697_v18 = vadd.f32 %v2589_v30, %v852_v12  ;;  %v2794_v15 = vld [vmem:[#allocation4 + $0x38] sm:$0xff] }
 0x553   : > { %v851_v19 = vmul.f32 0.5, %v790_v17  ;;  %v2700_v20 = vadd.f32 %v2589_v30, %v850_v14 }
 0x554   : > { %v2703_v22 = vadd.f32 %v2589_v30, %v853_v16 }
 0x555   : > { %902 = vmax.xlane.f32.xlu0 %v2700_v20  ;;  %v2707_v23 = vadd.f32 %v2589_v30, %v851_v19 }
 0x557   : > { %904 = vmax.xlane.f32.xlu1 %v2707_v23  ;;  %v2092_v24 = vpop.f32.mrb[4].mxu1 }
 0x558   : > { %v856_v25 = vmul.f32 0.5, %v2092_v24  ;;  %v803_v26 = vpop.f32.mrb[5].mxu1  ;;  %v2799_v24 = vld [vmem:[#allocation4 + $0x30] sm:$0xff] }
 0x559   : > { %906 = vmax.xlane.f32.xlu0 %v2697_v18  ;;  %v854_v28 = vmul.f32 0.5, %v803_v26  ;;  %v2093_v31 = vpop.f32.mrb[6].mxu1 }
 0x55a   : > { %v857_v32 = vmul.f32 0.5, %v2093_v31  ;;  %v806_v33 = vpop.f32.mrb[7].mxu1  ;;  %v2712_v34 = vadd.f32 %v2589_v30, %v856_v25 }
 0x55b   : > { %v855_v35 = vmul.f32 0.5, %v806_v33  ;;  %v2715_v36 = vadd.f32 %v2589_v30, %v854_v28  ;;  %v2817_v33 = vld [vmem:[#allocation4 + $0x20] sm:$0xff] }
 0x55c   : > { %v2718_v38 = vadd.f32 %v2589_v30, %v857_v32 }
 0x55d   : > { %908 = vmax.xlane.f32.xlu0 %v2703_v22  ;;  %v2722_v39 = vadd.f32 %v2589_v30, %v855_v35  ;;  %v2910_v35 = vld [vmem:[#allocation4 + $0x60] sm:$0xff] }
 0x55e   : > { %916 = vmax.xlane.f32.xlu1 %v2718_v38 }
 0x55f   : > { %v2096_v40 = vpop.f32.mrb[8].mxu1 }
 0x560   : > { %v860_v41 = vmul.f32 0.5, %v2096_v40  ;;  %v819_v42 = vpop.f32.mrb[9].mxu1  ;;  %v2823_v40 = vld [vmem:[#allocation4 + $0x58] sm:$0xff] }
 0x561   : > { %914 = vmax.xlane.f32.xlu0 %v2712_v34  ;;  %v858_v43 = vmul.f32 0.5, %v819_v42  ;;  %v2097_v44 = vpop.f32.mrb[10].mxu1 }
 0x562   : > { %v861_v45 = vmul.f32 0.5, %v2097_v44  ;;  %v822_v46 = vpop.f32.mrb[11].mxu1  ;;  %v2727_v47 = vadd.f32 %v2589_v30, %v860_v41  ;;  %v2828_v44 = vld [vmem:[#allocation4 + $0x28] sm:$0xff] }
 0x563   : > { %v859_v48 = vmul.f32 0.5, %v822_v46  ;;  %v2730_v49 = vadd.f32 %v2589_v30, %v858_v43 }
 0x564   : > { %v2733_v50 = vadd.f32 %v2589_v30, %v861_v45 }
 0x565   : > { %910 = vmax.xlane.f32.xlu0 %v2715_v36  ;;  %v2737_v51 = vadd.f32 %v2589_v30, %v859_v48  ;;  %v2838_v48 = vld [vmem:[#allocation4 + $0x48] sm:$0xff] }
 0x566   : > { %924 = vmax.xlane.f32.xlu1 %v2733_v50 }
 0x567   : > { %v2100_v52 = vpop.f32.mrb[12].mxu1 }
 0x568   : > { %v864_v53 = vmul.f32 0.5, %v2100_v52  ;;  %v835_v54 = vpop.f32.mrb[13].mxu1 }
 0x569   : > { %912 = vmax.xlane.f32.xlu0 %v2722_v39  ;;  %v862_v55 = vmul.f32 0.5, %v835_v54  ;;  %v2101_v56 = vpop.f32.mrb[14].mxu1 }
 0x56a   : > { %920 = vmax.xlane.f32.xlu1 %v2737_v51  ;;  %v865_v57 = vmul.f32 0.5, %v2101_v56  ;;  %v838_v59 = vpop.f32.mrb[15].mxu1  ;;  %v2743_v60 = vadd.f32 %v2589_v30, %v864_v53  ;;  %v2847_v56 = vld [vmem:[#allocation4 + $0x50] sm:$0xff] }
 0x56b   : > { %v863_v61 = vmul.f32 0.5, %v838_v59  ;;  %v2746_v62 = vadd.f32 %v2589_v30, %v862_v55 }
 0x56c   : > { %v2749_v63 = vadd.f32 %v2589_v30, %v865_v57 }
 0x56d   : > { %922 = vmax.xlane.f32.xlu0 %v2727_v47  ;;  %v2753_v1 = vadd.f32 %v2589_v30, %v863_v61  ;;  %v2765_v30 = vld [vmem:[#allocation4 + $0x8] sm:$0xff]  ;;  %v2858_v61 = vld [vmem:[#allocation4 + $0x78] sm:$0xff] }
 0x56e   : > { %932 = vmax.xlane.f32.xlu1 %v2749_v63 }
 0x571   : > { %918 = vmax.xlane.f32.xlu0 %v2730_v49 }
 0x572   : > { %928 = vmax.xlane.f32.xlu1 %v2753_v1 }
 0x587   : > { %588 = vperm.xlu0 %2250, %v580_v2  }
 0x5a6   : > { %930 = vmax.xlane.f32.xlu0 %v2743_v60 }
 0x5aa   : > { %926 = vmax.xlane.f32.xlu0 %v2746_v62 }
 0x5e2   : > { %v903_v4 = vpop.xlane.xlu0 %902 }
 0x5e3   : > { %v2768_v5 = vmax.f32 %v2763_v3, %v903_v4 }
 0x5e4   : > { %v905_v6 = vpop.xlane.xlu1 %904 }
 0x5e5   : > { %1493 = vst.msk [vmem:[#allocation4] sm:$0xff] %vm647_vm11, %v2768_v5  ;;  %v2777_v9 = vmax.f32 %v2765_v30, %v905_v6  ;;  %1000 = vperm.xlu1 %2249, %v2768_v5  }
 0x5e6   : > { %v907_v10 = vpop.xlane.xlu0 %906 }
 0x5e7   : > { %1494 = vst.msk [vmem:[#allocation4 + $0x8] sm:$0xff] %vm647_vm11, %v2777_v9  ;;  %v2785_v12 = vmax.f32 %v2770_v7, %v907_v10 }
 0x5e9   : > { %1495 = vst.msk [vmem:[#allocation4 + $0x10] sm:$0xff] %vm647_vm11, %v2785_v12  ;;  %1005 = vperm.xlu1 %2249, %v2777_v9  }
 0x5ea   : > { %v909_v16 = vpop.xlane.xlu0 %908 }
 0x5eb   : > { %v2797_v17 = vmax.f32 %v2787_v13, %v909_v16  ;;  %v917_v19 = vpop.xlane.xlu1 %916  ;;  %v2867_v16 = vld [vmem:[#allocation4 + $0x40] sm:$0xff] }
 0x5ec   : > { %v2802_v25 = vmax.f32 %v2794_v15, %v917_v19 }
 0x5ed   : > { %1496 = vst.msk [vmem:[#allocation4 + $0x18] sm:$0xff] %vm647_vm11, %v2797_v17  ;;  %1015 = vperm.xlu0 %2250, %v2797_v17   ;;  %1010 = vperm.xlu1 %2249, %v2785_v12  }
 0x5ee   : > { %v915_v28 = vpop.xlane.xlu0 %914  ;;  %1500 = vst.msk [vmem:[#allocation4 + $0x38] sm:$0xff] %vm647_vm11, %v2802_v25 }
 0x5ef   : > { %v2815_v32 = vmax.f32 %v2799_v24, %v915_v28 }
 0x5f1   : > { %1499 = vst.msk [vmem:[#allocation4 + $0x30] sm:$0xff] %vm647_vm11, %v2815_v32 }
 0x5f2   : > { %v911_v41 = vpop.xlane.xlu0 %910 }
 0x5f3   : > { %v2826_v42 = vmax.f32 %v2817_v33, %v911_v41  ;;  %v925_v43 = vpop.xlane.xlu1 %924  ;;  %v2877_v41 = vld [vmem:[#allocation4 + $0x68] sm:$0xff] }
 0x5f4   : > { %v2831_v45 = vmax.f32 %v2823_v40, %v925_v43 }
 0x5f5   : > { %1497 = vst.msk [vmem:[#allocation4 + $0x20] sm:$0xff] %vm647_vm11, %v2826_v42  ;;  %1020 = vperm.xlu1 %2249, %v2826_v42  }
 0x5f6   : > { %v913_v52 = vpop.xlane.xlu0 %912  ;;  %1504 = vst.msk [vmem:[#allocation4 + $0x58] sm:$0xff] %vm647_vm11, %v2831_v45 }
 0x5f7   : > { %v2845_v54 = vmax.f32 %v2828_v44, %v913_v52  ;;  %v921_v55 = vpop.xlane.xlu1 %920  ;;  %v2905_v52 = vld [vmem:[#allocation4 + $0x70] sm:$0xff] }
 0x5f8   : > { %v2850_v57 = vmax.f32 %v2838_v48, %v921_v55 }
 0x5f9   : > { %1498 = vst.msk [vmem:[#allocation4 + $0x28] sm:$0xff] %vm647_vm11, %v2845_v54  ;;  %1025 = vperm.xlu0 %2250, %v2845_v54   ;;  %1030 = vperm.xlu1 %2249, %v2815_v32  }
 0x5fa   : > { %v923_v2 = vpop.xlane.xlu0 %922  ;;  %1502 = vst.msk [vmem:[#allocation4 + $0x48] sm:$0xff] %vm647_vm11, %v2850_v57 }
 0x5fb   : > { %v2865_v6 = vmax.f32 %v2847_v56, %v923_v2  ;;  %v933_v10 = vpop.xlane.xlu1 %932 }
 0x5fc   : > { %v2870_v19 = vmax.f32 %v2858_v61, %v933_v10 }
 0x5fd   : > { %1503 = vst.msk [vmem:[#allocation4 + $0x50] sm:$0xff] %vm647_vm11, %v2865_v6  ;;  %1035 = vperm.xlu0 %2250, %v2802_v25  }
 0x5fe   : > { %v919_v43 = vpop.xlane.xlu0 %918  ;;  %1508 = vst.msk [vmem:[#allocation4 + $0x78] sm:$0xff] %vm647_vm11, %v2870_v19 }
 0x5ff   : > { %v2884_v55 = vmax.f32 %v2867_v16, %v919_v43  ;;  %v929_v2 = vpop.xlane.xlu1 %928 }
 0x600   : > { %v2887_v10 = vmax.f32 %v2877_v41, %v929_v2 }
 0x601   : > { %1501 = vst.msk [vmem:[#allocation4 + $0x40] sm:$0xff] %vm647_vm11, %v2884_v55  ;;  %1040 = vperm.xlu1 %2249, %v2884_v55   ;;  %1045 = vperm.xlu0 %2250, %v2850_v57  }
 0x602   : > { %1506 = vst.msk [vmem:[#allocation4 + $0x68] sm:$0xff] %vm647_vm11, %v2887_v10 }
 0x605   : > { %1050 = vperm.xlu1 %2249, %v2865_v6   ;;  %1055 = vperm.xlu0 %2250, %v2831_v45  }
 0x606   : > { %v589_v43 = vpop.permute.xlu0 %588 }
 0x607   : > { %v640_v2 = vadd.f32 %v2636_v58, %v589_v43 }
 0x609   : > { %644 = vst [vmem:[#allocation3 + $0x8] sm:$0xf] %v640_v2  ;;  %1065 = vperm.xlu0 %2250, %v2887_v10  }
 0x60d   : > { %1075 = vperm.xlu0 %2250, %v2870_v19  }
 0x610   : > { %v699_v53 = vld [vmem:[#allocation3 + $0x8] sm:$0xf] }
 0x611   : > { %v700_v28 = vpack.c.bf16 %v699_v53, %v699_v53 }
 0x613   : > { %2102 = vmatprep.subr.bf16.mxu0 %v700_v28 }
 0x614   : > { %2103 = vmatpush3.bf16.xpose.msra.mxu0 %v700_v28 }
 0x615   : > { %2155 = vmatprep.subr.mxu0 %v3199_v0 }
 0x633   : > { %v931_v4 = vpop.xlane.xlu0 %930 }
 0x634   : > { %v2908_v31 = vmax.f32 %v2905_v52, %v931_v4 }
 0x636   : > { %1507 = vst.msk [vmem:[#allocation4 + $0x70] sm:$0xff] %vm647_vm11, %v2908_v31 }
 0x637   : > { %v927_v43 = vpop.xlane.xlu0 %926 }
 0x638   : > { %v2917_v53 = vmax.f32 %v2910_v35, %v927_v43 }
 0x63a   : > { %1505 = vst.msk [vmem:[#allocation4 + $0x60] sm:$0xff] %vm647_vm11, %v2917_v53  ;;  %1060 = vperm.xlu1 %2249, %v2917_v53  }
 0x63e   : > { %1070 = vperm.xlu1 %2249, %v2908_v31  }
 0x664   : > { %v1001_v4 = vpop.permute.xlu1 %1000 }
 0x665   : > { %v1078_v2 = vsub.f32 %v2700_v20, %v1001_v4  ;;  %v3203_v20 = vsub.s32 0, %v2584_v27 }
 0x667   : > { %v1094_v58 = vmul.f32 1.442695, %v1078_v2  ;;  %v2932_v4 = vrot.slane %v2581_v21, %v3203_v20 }
 0x668   : > { %v1006_v59 = vpop.permute.xlu1 %1005 }
 0x669   : > { %2256 = vpow2.f32 %v1094_v58  ;;  %v1079_v46 = vsub.f32 %v2707_v23, %v1006_v59 }
 0x66b   : > { %v1096_v43 = vmul.f32 1.442695, %v1079_v46 }
 0x66c   : > { %v1016_v26 = vpop.permute.xlu0 %1015  ;;  %v1011_v14 = vpop.permute.xlu1 %1010 }
 0x66d   : > { %2258 = vpow2.f32 %v1096_v43  ;;  %v1081_v28 = vsub.f32 %v2703_v22, %v1016_v26  ;;  %v1080_v8 = vsub.f32 %v2697_v18, %v1011_v14 }
 0x66f   : > { %v1100_v0 = vmul.f32 1.442695, %v1081_v28  ;;  %v1098_v11 = vmul.f32 1.442695, %v1080_v8 }
 0x671   : > { %2260 = vpow2.f32 %v1100_v0 }
 0x672   : > { %2262 = vpow2.f32 %v1098_v11 }
 0x673   : > { %v2257_v29 = vpop.eup %2256 }
 0x674   : > { %1158 = vadd.xlane.f32.xlu1 %v2257_v29  ;;  %v1021_v23 = vpop.permute.xlu1 %1020  ;;  %v1228_v18 = vmul.f32 %v2257_v29, %v2932_v4 }
 0x675   : > { %v1082_v46 = vsub.f32 %v2715_v36, %v1021_v23 }
 0x677   : > { %v2259_v59 = vpop.eup %2258  ;;  %v1102_v58 = vmul.f32 1.442695, %v1082_v46 }
 0x678   : > { %v1026_v2 = vpop.permute.xlu0 %1025  ;;  %1160 = vadd.xlane.f32.xlu0 %v2259_v59  ;;  %v1031_v22 = vpop.permute.xlu1 %1030  ;;  %v1229_v0 = vmul.f32 %v2259_v59, %v2932_v4 }
 0x679   : > { %2264 = vpow2.f32 %v1102_v58  ;;  %v1083_v8 = vsub.f32 %v2722_v39, %v1026_v2  ;;  %v1084_v27 = vsub.f32 %v2712_v34, %v1031_v22 }
 0x67a   : > { %v1244_v21 = vpack.c.bf16 %v1229_v0, %v1228_v18 }
 0x67b   : > { %v2261_v11 = vpop.eup %2260  ;;  %v1104_v14 = vmul.f32 1.442695, %v1083_v8  ;;  %v1106_v26 = vmul.f32 1.442695, %v1084_v27 }
 0x67c   : > { %v2263_v28 = vpop.eup %2262  ;;  %v1036_v36 = vpop.permute.xlu0 %1035  ;;  %2104 = vmatprep.mubr.bf16.mxu0 %v1244_v21  ;;  %v1231_v43 = vmul.f32 %v2261_v11, %v2932_v4 }
 0x67d   : > { %2266 = vpow2.f32 %v1104_v14  ;;  %v1085_v20 = vsub.f32 %v2718_v38, %v1036_v36  ;;  %1162 = vadd.xlane.f32.xlu0 %v2263_v28  ;;  %v1230_v29 = vmul.f32 %v2263_v28, %v2932_v4 }
 0x67e   : > { %2268 = vpow2.f32 %v1106_v26 }
 0x67f   : > { %v1108_v23 = vmul.f32 1.442695, %v1085_v20  ;;  %v1245_v39 = vpack.c.bf16 %v1231_v43, %v1230_v29 }
 0x680   : > { %v1046_v46 = vpop.permute.xlu0 %1045  ;;  %v1041_v34 = vpop.permute.xlu1 %1040 }
 0x681   : > { %2270 = vpow2.f32 %v1108_v23  ;;  %v1087_v59 = vsub.f32 %v2737_v51, %v1046_v46  ;;  %1164 = vadd.xlane.f32.xlu0 %v2261_v11  ;;  %v1086_v58 = vsub.f32 %v2730_v49, %v1041_v34  ;;  %2105 = vmatmul.mubr.bf16.vlgmr.msra.gmra.mrb[8].mxu0 %v1245_v39 }
 0x683   : > { %v2265_v2 = vpop.eup %2264  ;;  %v1112_v22 = vmul.f32 1.442695, %v1087_v59  ;;  %v1110_v18 = vmul.f32 1.442695, %v1086_v58 }
 0x684   : > { %v1056_v0 = vpop.permute.xlu0 %1055  ;;  %1166 = vadd.xlane.f32.xlu1 %v2265_v2  ;;  %v1051_v38 = vpop.permute.xlu1 %1050  ;;  %v1232_v49 = vmul.f32 %v2265_v2, %v2932_v4 }
 0x685   : > { %2272 = vpow2.f32 %v1112_v22  ;;  %v1089_v8 = vsub.f32 %v2733_v50, %v1056_v0  ;;  %v1088_v27 = vsub.f32 %v2727_v47, %v1051_v38 }
 0x686   : > { %2274 = vpow2.f32 %v1110_v18 }
 0x687   : > { %v2267_v21 = vpop.eup %2266  ;;  %v1116_v14 = vmul.f32 1.442695, %v1089_v8  ;;  %v1114_v26 = vmul.f32 1.442695, %v1088_v27 }
 0x688   : > { %v2269_v51 = vpop.eup %2268  ;;  %v1066_v11 = vpop.permute.xlu0 %1065  ;;  %1168 = vadd.xlane.f32.xlu0 %v2267_v21  ;;  %v1233_v28 = vmul.f32 %v2267_v21, %v2932_v4 }
 0x689   : > { %2276 = vpow2.f32 %v1116_v14  ;;  %v1091_v36 = vsub.f32 %v2753_v1, %v1066_v11  ;;  %1170 = vadd.xlane.f32.xlu1 %v2269_v51  ;;  %v1234_v29 = vmul.f32 %v2269_v51, %v2932_v4  ;;  %v3204_v14 = vsub.f32 %v2765_v30, %v2777_v9 }
 0x68a   : > { %2278 = vpow2.f32 %v1114_v26  ;;  %v1246_v43 = vpack.c.bf16 %v1233_v28, %v1232_v49 }
 0x68b   : > { %v2271_v50 = vpop.eup %2270  ;;  %v1120_v20 = vmul.f32 1.442695, %v1091_v36  ;;  %v968_v26 = vmul.f32 1.442695, %v3204_v14 }
 0x68c   : > { %v1076_v47 = vpop.permute.xlu0 %1075  ;;  %1172 = vadd.xlane.f32.xlu0 %v2271_v50  ;;  %2108 = vmatprep.mubr.bf16.mxu0 %v1246_v43  ;;  %v1235_v23 = vmul.f32 %v2271_v50, %v2932_v4 }
 0x68d   : > { %2280 = vpow2.f32 %v1120_v20  ;;  %v1093_v39 = vsub.f32 %v2749_v63, %v1076_v47 }
 0x68e   : > { %v1247_v46 = vpack.c.bf16 %v1235_v23, %v1234_v29 }
 0x68f   : > { %v2273_v34 = vpop.eup %2272  ;;  %v1124_v59 = vmul.f32 1.442695, %v1093_v39 }
 0x690   : > { %v2275_v58 = vpop.eup %2274  ;;  %1176 = vadd.xlane.f32.xlu0 %v2273_v34  ;;  %2109 = vmatmul.mubr.bf16.gmra.mrb[12].mxu0 %v1247_v46  ;;  %v1237_v1 = vmul.f32 %v2273_v34, %v2932_v4  ;;  %v3205_v46 = vmov 0.0  }
 0x691   : > { %2282 = vpow2.f32 %v1124_v59  ;;  %1174 = vadd.xlane.f32.xlu1 %v2275_v58  ;;  %v1236_v2 = vmul.f32 %v2275_v58, %v2932_v4  ;;  %v3207_v59 = vsub.f32 %v2770_v7, %v2785_v12  ;;  %v1127_v12 = vld [vmem:[#allocation5 + $0x8] sm:$0xff] }
 0x692   : > { %2284 = vpow2.f32 %v968_v26 }
 0x693   : > { %v2277_v22 = vpop.eup %2276  ;;  %v1248_v18 = vpack.c.bf16 %v1237_v1, %v1236_v2  ;;  %v970_v58 = vmul.f32 1.442695, %v3207_v59  ;;  %v3208_v1 = vsub.f32 %v2787_v13, %v2797_v17  ;;  %v3210_v13 = vsub.f32 %v2828_v44, %v2845_v54 }
 0x694   : > { %v2279_v0 = vpop.eup %2278  ;;  %1180 = vadd.xlane.f32.xlu0 %v2277_v22  ;;  %v1239_v38 = vmul.f32 %v2277_v22, %v2932_v4  ;;  %v3213_v54 = vsub.f32 %v2838_v48, %v2850_v57  ;;  %v3215_v48 = vsub.f32 %v2823_v40, %v2831_v45  ;;  %v3217_v40 = vsub.f32 %v2877_v41, %v2887_v10 }
 0x695   : > { %1178 = vadd.xlane.f32.xlu1 %v2279_v0  ;;  %2112 = vmatprep.mubr.bf16.mxu0 %v1248_v18  ;;  %v1238_v63 = vmul.f32 %v2279_v0, %v2932_v4  ;;  %v1126_v0 = vld [vmem:[#allocation5] sm:$0xff]  ;;  %v976_v17 = vmul.f32 1.442695, %v3210_v13 }
 0x696   : > { %v988_v57 = vmul.f32 1.442695, %v3215_v48  ;;  %v992_v45 = vmul.f32 1.442695, %v3217_v40  ;;  %v3219_v40 = vsub.f32 %v2910_v35, %v2917_v53 }
 0x697   : > { %v2281_v8 = vpop.eup %2280  ;;  %v1249_v27 = vpack.c.bf16 %v1239_v38, %v1238_v63 }
 0x698   : > { %1184 = vadd.xlane.f32.xlu0 %v2281_v8  ;;  %v1241_v29 = vmul.f32 %v2281_v8, %v2932_v4  ;;  %v3211_v8 = vsub.f32 %v2799_v24, %v2815_v32  ;;  %v984_v24 = vmul.f32 1.442695, %v3213_v54 }
 0x699   : > { %2113 = vmatmul.mubr.bf16.gmra.mrb[16].mxu0 %v1249_v27 }
 0x69a   : > { %v978_v27 = vmul.f32 1.442695, %v3211_v8 }
 0x69b   : > { %v2283_v21 = vpop.eup %2282 }
 0x69c   : > { %1188 = vadd.xlane.f32.xlu0 %v2283_v21  ;;  %v2285_v51 = vpop.eup %2284 }
 0x6b2   : > { %1372 = vperm.xlu0 %2250, %v2285_v51  }
 0x6b9   : > { %v1061_v11 = vpop.permute.xlu1 %1060 }
 0x6ba   : > { %v1090_v49 = vsub.f32 %v2746_v62, %v1061_v11  ;;  %v1243_v62 = vmul.f32 %v2283_v21, %v2932_v4  ;;  %v1143_v21 = vmul.f32 %v2285_v51, %v1127_v12  ;;  %v3214_v51 = vsub.f32 %v2867_v16, %v2884_v55  ;;  %v1135_v12 = vld [vmem:[#allocation5 + $0x48] sm:$0xff] }
 0x6bb   : > { %v3216_v16 = vsub.f32 %v2847_v56, %v2865_v6 }
 0x6bc   : > { %v1118_v28 = vmul.f32 1.442695, %v1090_v49  ;;  %v1129_v49 = vld [vmem:[#allocation5 + $0x18] sm:$0xff] }
 0x6bd   : > { %v1071_v36 = vpop.permute.xlu1 %1070  ;;  %v986_v55 = vmul.f32 1.442695, %v3216_v16  ;;  %v1141_v16 = vld [vmem:[#allocation5 + $0x78] sm:$0xff] }
 0x6be   : > { %2286 = vpow2.f32 %v1118_v28  ;;  %v1092_v43 = vsub.f32 %v2743_v60, %v1071_v36  ;;  %v3206_v60 = vsub.f32 %v2763_v3, %v2768_v5  ;;  %v3209_v3 = vsub.f32 %v2817_v33, %v2826_v42  ;;  %v1128_v33 = vld [vmem:[#allocation5 + $0x10] sm:$0xff] }
 0x6bf   : > { %v3212_v42 = vsub.f32 %v2794_v15, %v2802_v25  ;;  %v982_v28 = vmul.f32 1.442695, %v3214_v51 }
 0x6c0   : > { %v1122_v50 = vmul.f32 1.442695, %v1092_v43  ;;  %v966_v34 = vmul.f32 1.442695, %v3206_v60  ;;  %v974_v5 = vmul.f32 1.442695, %v3209_v3 }
 0x6c1   : > { %v980_v11 = vmul.f32 1.442695, %v3212_v42  ;;  %v1132_v60 = vld [vmem:[#allocation5 + $0x30] sm:$0xff] }
 0x6c2   : > { %2288 = vpow2.f32 %v1122_v50  ;;  %v1130_v50 = vld [vmem:[#allocation5 + $0x20] sm:$0xff] }
 0x6c3   : > { %2290 = vpow2.f32 %v966_v34 }
 0x6c4   : > { %2292 = vpow2.f32 %v970_v58 }
 0x6c8   : > { %v2287_v20 = vpop.eup %2286 }
 0x6c9   : > { %v1240_v47 = vmul.f32 %v2287_v20, %v2932_v4 }
 0x6cb   : > { %v1250_v30 = vpack.c.bf16 %v1241_v29, %v1240_v47 }
 0x6cc   : > { %v2289_v9 = vpop.eup %2288 }
 0x6cd   : > { %1186 = vadd.xlane.f32.xlu1 %v2289_v9  ;;  %2116 = vmatprep.mubr.bf16.mxu0 %v1250_v30  ;;  %v1242_v23 = vmul.f32 %v2289_v9, %v2932_v4  ;;  %v972_v4 = vmul.f32 1.442695, %v3208_v1  ;;  %v2291_v2 = vpop.eup %2290  ;;  %v1133_v1 = vld [vmem:[#allocation5 + $0x38] sm:$0xff] }
 0x6ce   : > { %v2293_v22 = vpop.eup %2292  ;;  %v1142_v38 = vmul.f32 %v2291_v2, %v1126_v0 }
 0x6cf   : > { %v1251_v39 = vpack.c.bf16 %v1243_v62, %v1242_v23  ;;  %2294 = vpow2.f32 %v972_v4  ;;  %v1144_v44 = vmul.f32 %v2293_v22, %v1128_v33  ;;  %v1131_v62 = vld [vmem:[#allocation5 + $0x28] sm:$0xff] }
 0x6d0   : > { %2296 = vpow2.f32 %v974_v5 }
 0x6d1   : > { %1182 = vadd.xlane.f32.xlu1 %v2287_v20  ;;  %2117 = vmatmul.mubr.bf16.gmra.mrb[20].mxu0 %v1251_v39  ;;  %2298 = vpow2.f32 %v976_v17 }
 0x6d2   : > { %2157 = vmatprep.mubr.msk.f32.mxu0 %vm2419_vm2, %v3205_v46  ;;  %2300 = vpow2.f32 %v978_v27 }
 0x6d3   : > { %2302 = vpow2.f32 %v980_v11  ;;  %v1136_v11 = vld [vmem:[#allocation5 + $0x50] sm:$0xff] }
 0x6d9   : > { %v2295_v18 = vpop.eup %2294 }
 0x6da   : > { %v2297_v15 = vpop.eup %2296  ;;  %v1145_v25 = vmul.f32 %v2295_v18, %v1129_v49 }
 0x6db   : > { %v1146_v30 = vmul.f32 %v2297_v15, %v1130_v50  ;;  %v2299_v9 = vpop.eup %2298 }
 0x6dc   : > { %v3004_v39 = vpop.eup %2300  ;;  %v1147_v56 = vmul.f32 %v2299_v9, %v1131_v62 }
 0x6dd   : > { %v3010_v34 = vpop.eup %2302  ;;  %v1148_v58 = vmul.f32 %v3004_v39, %v1132_v60 }
 0x6de   : > { %v1149_v3 = vmul.f32 %v3010_v34, %v1133_v1 }
 0x6e2   : > { %1367 = vperm.xlu1 %2249, %v2291_v2  }
 0x6e6   : > { %1377 = vperm.xlu1 %2249, %v2293_v22  }
 0x6ea   : > { %1382 = vperm.xlu1 %2249, %v2295_v18   ;;  %v3218_v18 = vsub.f32 %v2858_v61, %v2870_v19  ;;  %v1134_v19 = vld [vmem:[#allocation5 + $0x40] sm:$0xff] }
 0x6ec   : > { %v996_v41 = vmul.f32 1.442695, %v3218_v18 }
 0x701   : > { %v1159_v7 = vpop.xlane.xlu1 %1158 }
 0x702   : > { %v1190_v63 = vadd.f32 %v1159_v7, %v1142_v38 }
 0x704   : > { %1206 = vst.msk [vmem:[#allocation5] sm:$0xff] %vm647_vm11, %v1190_v63 }
 0x705   : > { %v1161_v14 = vpop.xlane.xlu0 %1160 }
 0x706   : > { %v1191_v26 = vadd.f32 %v1161_v14, %v1143_v21  ;;  %v1137_v14 = vld [vmem:[#allocation5 + $0x58] sm:$0xff] }
 0x708   : > { %1207 = vst.msk [vmem:[#allocation5 + $0x8] sm:$0xff] %vm647_vm11, %v1191_v26 }
 0x70a   : > { %v1163_v32 = vpop.xlane.xlu0 %1162 }
 0x70b   : > { %v1192_v36 = vadd.f32 %v1163_v32, %v1144_v44  ;;  %v1525_v43 = vld [vmem:[#allocation5] sm:$0xff] }
 0x70c   : > { %2304 = vrcp.f32 %v1525_v43  ;;  %v2424_v43 = vmov 0.0|0.0  }
 0x70d   : > { %1208 = vst.msk [vmem:[#allocation5 + $0x10] sm:$0xff] %vm647_vm11, %v1192_v36  ;;  %2306 = vpow2.f32 %v984_v24  ;;  %v1139_v36 = vld [vmem:[#allocation5 + $0x68] sm:$0xff]  ;;  %2160 = vmatprep.subr.bf16.mxu1 %v2424_v43 }
 0x70e   : > { %v1165_v20 = vpop.xlane.xlu0 %1164  ;;  %2308 = vpow2.f32 %v982_v28 }
 0x70f   : > { %v1193_v47 = vadd.f32 %v1165_v20, %v1145_v25  ;;  %v1526_v29 = vld [vmem:[#allocation5 + $0x8] sm:$0xff] }
 0x710   : > { %2310 = vrcp.f32 %v1526_v29 }
 0x711   : > { %1209 = vst.msk [vmem:[#allocation5 + $0x18] sm:$0xff] %vm647_vm11, %v1193_v47  ;;  %v1167_v23 = vpop.xlane.xlu1 %1166  ;;  %2312 = vpow2.f32 %v988_v57 }
 0x712   : > { %v1194_v46 = vadd.f32 %v1167_v23, %v1146_v30  ;;  %2314 = vpow2.f32 %v986_v55 }
 0x714   : > { %1210 = vst.msk [vmem:[#allocation5 + $0x20] sm:$0xff] %vm647_vm11, %v1194_v46  ;;  %v1527_v6 = vld [vmem:[#allocation5 + $0x10] sm:$0xff] }
 0x715   : > { %v1169_v59 = vpop.xlane.xlu0 %1168  ;;  %2316 = vrcp.f32 %v1527_v6 }
 0x716   : > { %v2305_v4 = vpop.eup %2304  ;;  %v1195_v2 = vadd.f32 %v1169_v59, %v1147_v56  ;;  %v1171_v22 = vpop.xlane.xlu1 %1170  ;;  %2318 = vpow2.f32 %v992_v45  ;;  %v990_v45 = vmul.f32 1.442695, %v3219_v40 }
 0x717   : > { %v1196_v10 = vadd.f32 %v1171_v22, %v1148_v58  ;;  %1559 = vperm.xlu1 %2249, %v2305_v4   ;;  %v3016_v0 = vpop.eup %2306  ;;  %v3220_v58 = vsub.f32 %v2905_v52, %v2908_v31 }
 0x718   : > { %1211 = vst.msk [vmem:[#allocation5 + $0x28] sm:$0xff] %vm647_vm11, %v1195_v2  ;;  %v1528_v5 = vld [vmem:[#allocation5 + $0x18] sm:$0xff]  ;;  %v3020_v38 = vpop.eup %2308  ;;  %v1151_v17 = vmul.f32 %v3016_v0, %v1135_v12 }
 0x719   : > { %1212 = vst.msk [vmem:[#allocation5 + $0x30] sm:$0xff] %vm647_vm11, %v1196_v10  ;;  %v1173_v7 = vpop.xlane.xlu0 %1172  ;;  %2320 = vrcp.f32 %v1528_v5  ;;  %v1150_v21 = vmul.f32 %v3020_v38, %v1134_v19  ;;  %v994_v35 = vmul.f32 1.442695, %v3220_v58  ;;  %v1350_v5 = vld [vmem:[#allocation6 + $0x8] sm:$0xff]  ;;  %v1140_v19 = vld [vmem:[#allocation5 + $0x70] sm:$0xff] }
 0x71a   : > { %v2311_v63 = vpop.eup %2310  ;;  %v1197_v61 = vadd.f32 %v1173_v7, %v1149_v3  ;;  %2322 = vpow2.f32 %v996_v41  ;;  %v1806_v3 = vld [vmem:[%s3197_s9] sm:$0xff] }
 0x71b   : > { %1564 = vperm.xlu0 %2250, %v2311_v63   ;;  %1387 = vperm.xlu1 %2249, %v2297_v15   ;;  %v1529_v13 = vld [vmem:[#allocation5 + $0x20] sm:$0xff]  ;;  %v3025_v8 = vpop.eup %2312 }
 0x71c   : > { %1213 = vst.msk [vmem:[#allocation5 + $0x38] sm:$0xff] %vm647_vm11, %v1197_v61  ;;  %2324 = vrcp.f32 %v1529_v13  ;;  %v2315_v26 = vpop.eup %2314  ;;  %v1153_v32 = vmul.f32 %v3025_v8, %v1137_v14 }
 0x71d   : > { %v1177_v27 = vpop.xlane.xlu0 %1176  ;;  %v1152_v28 = vmul.f32 %v2315_v26, %v1136_v11  ;;  %v1349_v11 = vld [vmem:[#allocation6] sm:$0xff] }
 0x71e   : > { %v1199_v33 = vadd.f32 %v1177_v27, %v1151_v17  ;;  %v1175_v42 = vpop.xlane.xlu1 %1174 }
 0x71f   : > { %v2317_v44 = vpop.eup %2316  ;;  %v1198_v54 = vadd.f32 %v1175_v42, %v1150_v21  ;;  %1392 = vperm.xlu0 %2250, %v2299_v9   ;;  %v1530_v24 = vld [vmem:[#allocation5 + $0x28] sm:$0xff]  ;;  %v1138_v21 = vld [vmem:[#allocation5 + $0x60] sm:$0xff] }
 0x720   : > { %1215 = vst.msk [vmem:[#allocation5 + $0x48] sm:$0xff] %vm647_vm11, %v1199_v33  ;;  %1569 = vperm.xlu1 %2249, %v2317_v44   ;;  %2326 = vrcp.f32 %v1530_v24  ;;  %v2319_v49 = vpop.eup %2318  ;;  %v1531_v50 = vld [vmem:[#allocation5 + $0x30] sm:$0xff] }
 0x721   : > { %1214 = vst.msk [vmem:[#allocation5 + $0x40] sm:$0xff] %vm647_vm11, %v1198_v54  ;;  %v1181_v51 = vpop.xlane.xlu0 %1180  ;;  %v1155_v57 = vmul.f32 %v2319_v49, %v1139_v36  ;;  %2328 = vrcp.f32 %v1531_v50 }
 0x722   : > { %v1201_v15 = vadd.f32 %v1181_v51, %v1153_v32  ;;  %v1179_v25 = vpop.xlane.xlu1 %1178 }
 0x723   : > { %v2321_v20 = vpop.eup %2320  ;;  %v1200_v48 = vadd.f32 %v1179_v25, %v1152_v28  ;;  %v1532_v9 = vld [vmem:[#allocation5 + $0x38] sm:$0xff] }
 0x724   : > { %1217 = vst.msk [vmem:[#allocation5 + $0x58] sm:$0xff] %vm647_vm11, %v1201_v15  ;;  %1574 = vperm.xlu0 %2250, %v2321_v20   ;;  %1397 = vperm.xlu1 %2249, %v3004_v39   ;;  %v2323_v47 = vpop.eup %2322  ;;  %2330 = vrcp.f32 %v1532_v9  ;;  %v1352_v20 = vld [vmem:[#allocation6 + $0x18] sm:$0xff] }
 0x725   : > { %1216 = vst.msk [vmem:[#allocation5 + $0x50] sm:$0xff] %vm647_vm11, %v1200_v48  ;;  %v1185_v29 = vpop.xlane.xlu0 %1184  ;;  %v1157_v23 = vmul.f32 %v2323_v47, %v1141_v16 }
 0x726   : > { %v2325_v55 = vpop.eup %2324  ;;  %v1203_v30 = vadd.f32 %v1185_v29, %v1155_v57 }
 0x727   : > { %v1534_v56 = vld [vmem:[#allocation5 + $0x48] sm:$0xff] }
 0x728   : > { %1219 = vst.msk [vmem:[#allocation5 + $0x68] sm:$0xff] %vm647_vm11, %v1203_v30  ;;  %1402 = vperm.xlu0 %2250, %v3010_v34   ;;  %1579 = vperm.xlu1 %2249, %v2325_v55   ;;  %v1533_v60 = vld [vmem:[#allocation5 + $0x40] sm:$0xff] }
 0x729   : > { %v1189_v62 = vpop.xlane.xlu0 %1188  ;;  %2332 = vrcp.f32 %v1533_v60 }
 0x72a   : > { %v2327_v46 = vpop.eup %2326  ;;  %v1205_v39 = vadd.f32 %v1189_v62, %v1157_v23  ;;  %2334 = vpow2.f32 %v990_v45  ;;  %v1353_v45 = vld [vmem:[#allocation6 + $0x20] sm:$0xff] }
 0x72b   : > { %v2329_v6 = vpop.eup %2328  ;;  %2336 = vrcp.f32 %v1534_v56  ;;  %v1536_v53 = vld [vmem:[#allocation5 + $0x58] sm:$0xff] }
 0x72c   : > { %1221 = vst.msk [vmem:[#allocation5 + $0x78] sm:$0xff] %vm647_vm11, %v1205_v39  ;;  %1584 = vperm.xlu0 %2250, %v2327_v46   ;;  %1407 = vperm.xlu1 %2249, %v3020_v38   ;;  %v1535_v34 = vld [vmem:[#allocation5 + $0x50] sm:$0xff]  ;;  %v1670_v39 = vld [vmem:[%s3195_s7] sm:$0xff] }
 0x72d   : > { %2338 = vrcp.f32 %v1535_v34 }
 0x72e   : > { %v2331_v59 = vpop.eup %2330  ;;  %2340 = vpow2.f32 %v994_v35 }
 0x72f   : > { %2342 = vrcp.f32 %v1536_v53  ;;  %v1538_v22 = vld [vmem:[#allocation5 + $0x68] sm:$0xff] }
 0x730   : > { %1412 = vperm.xlu0 %2250, %v3016_v0   ;;  %1589 = vperm.xlu1 %2249, %v2329_v6   ;;  %2344 = vrcp.f32 %v1538_v22  ;;  %v1354_v53 = vld [vmem:[#allocation6 + $0x28] sm:$0xff] }
 0x731   : > { %v1373_v38 = vpop.permute.xlu0 %1372 }
 0x732   : > { %v1446_v63 = vmul.f32 %v1373_v38, %v1350_v5 }
 0x733   : > { %v2333_v1 = vpop.eup %2332  ;;  %v1540_v52 = vld [vmem:[#allocation5 + $0x78] sm:$0xff] }
 0x734   : > { %1594 = vperm.xlu0 %2250, %v2331_v59   ;;  %1417 = vperm.xlu1 %2249, %v2315_v26   ;;  %v2335_v4 = vpop.eup %2334  ;;  %2346 = vrcp.f32 %v1540_v52 }
 0x735   : > { %v2337_v2 = vpop.eup %2336  ;;  %v1154_v26 = vmul.f32 %v2335_v4, %v1138_v21 }
 0x737   : > { %v2339_v18 = vpop.eup %2338 }
 0x738   : > { %1422 = vperm.xlu0 %2250, %v3025_v8   ;;  %1599 = vperm.xlu1 %2249, %v2333_v1   ;;  %v2341_v31 = vpop.eup %2340 }
 0x739   : > { %v2343_v41 = vpop.eup %2342  ;;  %v1156_v8 = vmul.f32 %v2341_v31, %v1140_v19 }
 0x73a   : > { %v2345_v10 = vpop.eup %2344 }
 0x73c   : > { %1604 = vperm.xlu0 %2250, %v2337_v2   ;;  %1427 = vperm.xlu1 %2249, %v2335_v4  }
 0x73e   : > { %v2347_v0 = vpop.eup %2346 }
 0x740   : > { %1432 = vperm.xlu0 %2250, %v2319_v49   ;;  %1609 = vperm.xlu1 %2249, %v2339_v18   ;;  %v1351_v49 = vld [vmem:[#allocation6 + $0x10] sm:$0xff]  ;;  %v1805_v18 = vld [vmem:[%s3196_s8] sm:$0xff] }
 0x744   : > { %1614 = vperm.xlu0 %2250, %v2343_v41   ;;  %1437 = vperm.xlu1 %2249, %v2341_v31  }
 0x748   : > { %1442 = vperm.xlu0 %2250, %v2323_v47  }
 0x74c   : > { %1624 = vperm.xlu0 %2250, %v2345_v10  }
 0x750   : > { %1634 = vperm.xlu0 %2250, %v2347_v0  }
 0x754   : > { %1809 = vperm.xlu0 %2250, %v1806_v3   ;;  %v2106_v7 = vpop.f32.mrb[8].mxu0  ;;  %v1355_v3 = vld [vmem:[#allocation6 + $0x30] sm:$0xff] }
 0x755   : > { %v1286_v12 = vpop.f32.mrb[9].mxu0 }
 0x756   : > { %v2107_v61 = vpop.f32.mrb[10].mxu0 }
 0x757   : > { %v1289_v13 = vpop.f32.mrb[11].mxu0 }
 0x758   : > { %v1462_v17 = vadd.f32 %v1446_v63, %v1289_v13 }
 0x75a   : > { %1478 = vst.msk [vmem:[#allocation6 + $0x8] sm:$0xff] %vm680_vm9, %v1462_v17  ;;  %v1187_v27 = vpop.xlane.xlu1 %1186  ;;  %v1356_v17 = vld [vmem:[#allocation6 + $0x38] sm:$0xff] }
 0x75b   : > { %v1204_v14 = vadd.f32 %v1187_v27, %v1156_v8 }
 0x75d   : > { %1220 = vst.msk [vmem:[#allocation5 + $0x70] sm:$0xff] %vm647_vm11, %v1204_v14 }
 0x75e   : > { %v1183_v33 = vpop.xlane.xlu1 %1182 }
 0x75f   : > { %v1202_v42 = vadd.f32 %v1183_v33, %v1154_v26 }
 0x761   : > { %1218 = vst.msk [vmem:[#allocation5 + $0x60] sm:$0xff] %vm647_vm11, %v1202_v42  ;;  %v1510_v34 = vld [vmem:[#allocation6 + $0x8] sm:$0xff] }
 0x762   : > { %v1368_v44 = vpop.permute.xlu1 %1367 }
 0x763   : > { %v1445_v54 = vmul.f32 %v1368_v44, %v1349_v11  ;;  %v3053_v24 = vpop.f32.mrb[12].mxu0 }
 0x764   : > { %v1302_v32 = vpop.f32.mrb[13].mxu0  ;;  %v1539_v57 = vld [vmem:[#allocation5 + $0x70] sm:$0xff] }
 0x765   : > { %v1461_v51 = vadd.f32 %v1445_v54, %v1286_v12  ;;  %v3055_v28 = vpop.f32.mrb[14].mxu0 }
 0x766   : > { %v1378_v36 = vpop.permute.xlu1 %1377  ;;  %v1305_v15 = vpop.f32.mrb[15].mxu0 }
 0x767   : > { %1477 = vst.msk [vmem:[#allocation6] sm:$0xff] %vm680_vm9, %v1461_v51  ;;  %v1447_v25 = vmul.f32 %v1378_v36, %v1351_v49 }
 0x768   : > { %v1537_v50 = vld [vmem:[#allocation5 + $0x60] sm:$0xff] }
 0x769   : > { %2348 = vrcp.f32 %v1537_v50  ;;  %v1463_v48 = vadd.f32 %v2106_v7, %v1447_v25 }
 0x76a   : > { %v1383_v47 = vpop.permute.xlu1 %1382  ;;  %2350 = vrcp.f32 %v1539_v57 }
 0x76b   : > { %1479 = vst.msk [vmem:[#allocation6 + $0x10] sm:$0xff] %vm680_vm9, %v1463_v48  ;;  %v1448_v29 = vmul.f32 %v1383_v47, %v1352_v20  ;;  %v1358_v20 = vld [vmem:[#allocation6 + $0x48] sm:$0xff] }
 0x76c   : > { %v3059_v16 = vpop.f32.mrb[16].mxu0 }
 0x76d   : > { %v1464_v55 = vadd.f32 %v2107_v61, %v1448_v29  ;;  %v3061_v30 = vpop.f32.mrb[17].mxu0 }
 0x76e   : > { %v3063_v9 = vpop.f32.mrb[18].mxu0  ;;  %v1509_v40 = vld [vmem:[#allocation6] sm:$0xff] }
 0x76f   : > { %1480 = vst.msk [vmem:[#allocation6 + $0x18] sm:$0xff] %vm680_vm9, %v1464_v55  ;;  %v3066_v23 = vpop.f32.mrb[19].mxu0 }
 0x772   : > { %v1511_v0 = vld [vmem:[#allocation6 + $0x10] sm:$0xff] }
 0x773   : > { %v2349_v62 = vpop.eup %2348 }
 0x774   : > { %1619 = vperm.xlu1 %2249, %v2349_v62   ;;  %v2351_v46 = vpop.eup %2350 }
 0x776   : > { %v1512_v7 = vld [vmem:[#allocation6 + $0x18] sm:$0xff] }
 0x778   : > { %1629 = vperm.xlu1 %2249, %v2351_v46  }
 0x77c   : > { %1673 = vperm.xlu1 %2249, %v1670_v39   ;;  %v1359_v39 = vld [vmem:[#allocation6 + $0x50] sm:$0xff] }
 0x796   : > { %v1560_v60 = vpop.permute.xlu1 %1559 }
 0x797   : > { %v1637_v56 = vmul.f32 %v1560_v60, %v1509_v40 }
 0x799   : > { %v1654_v1 = vmax.f32 %v1637_v56, 0.0 }
 0x79a   : > { %v1565_v6 = vpop.permute.xlu0 %1564  ;;  %v1388_v59 = vpop.permute.xlu1 %1387 }
 0x79b   : > { %v1638_v58 = vmul.f32 %v1565_v6, %v1510_v34  ;;  %v1449_v35 = vmul.f32 %v1388_v59, %v1353_v45  ;;  %v1360_v59 = vld [vmem:[#allocation6 + $0x58] sm:$0xff] }
 0x79d   : > { %v1655_v4 = vmax.f32 %v1638_v58, 0.0  ;;  %v1465_v2 = vadd.f32 %v1449_v35, %v1302_v32  ;;  %v1357_v32 = vld [vmem:[#allocation6 + $0x40] sm:$0xff] }
 0x79e   : > { %v1393_v22 = vpop.permute.xlu0 %1392 }
 0x79f   : > { %v2161_v31 = vpack.c.bf16 %v1655_v4, %v1654_v1  ;;  %1481 = vst.msk [vmem:[#allocation6 + $0x20] sm:$0xff] %vm680_vm9, %v1465_v2  ;;  %v1450_v52 = vmul.f32 %v1393_v22, %v1354_v53  ;;  %v1570_v41 = vpop.permute.xlu1 %1569 }
 0x7a0   : > { %v1639_v5 = vmul.f32 %v1570_v41, %v1511_v0 }
 0x7a1   : > { %v1466_v10 = vadd.f32 %v1450_v52, %v1305_v15  ;;  %2163 = vmatpush3.bf16.xpose.msk.msra.mxu1 %vm3073_vm12, %v2161_v31  ;;  %v1361_v31 = vld [vmem:[#allocation6 + $0x60] sm:$0xff] }
 0x7a2   : > { %2164 = vmatprep.subr.bf16.mxu1 %v2424_v43  ;;  %v1656_v8 = vmax.f32 %v1639_v5, 0.0 }
 0x7a3   : > { %1482 = vst.msk [vmem:[#allocation6 + $0x28] sm:$0xff] %vm680_vm9, %v1466_v10  ;;  %v1575_v38 = vpop.permute.xlu0 %1574  ;;  %v1398_v12 = vpop.permute.xlu1 %1397 }
 0x7a4   : > { %v1640_v63 = vmul.f32 %v1575_v38, %v1512_v7  ;;  %v1451_v61 = vmul.f32 %v1398_v12, %v1355_v3  ;;  %v3082_v19 = vpop.f32.mrb[20].mxu0  ;;  %v1362_v38 = vld [vmem:[#allocation6 + $0x68] sm:$0xff] }
 0x7a5   : > { %v3084_v13 = vpop.f32.mrb[21].mxu0 }
 0x7a6   : > { %v1657_v27 = vmax.f32 %v1640_v63, 0.0  ;;  %v1467_v21 = vadd.f32 %v3053_v24, %v1451_v61  ;;  %v3087_v14 = vpop.f32.mrb[22].mxu0  ;;  %v1513_v42 = vld [vmem:[#allocation6 + $0x20] sm:$0xff] }
 0x7a7   : > { %v1403_v26 = vpop.permute.xlu0 %1402  ;;  %v1580_v33 = vpop.permute.xlu1 %1579 }
 0x7a8   : > { %v2165_v11 = vpack.c.bf16 %v1657_v27, %v1656_v8  ;;  %1483 = vst.msk [vmem:[#allocation6 + $0x30] sm:$0xff] %vm680_vm9, %v1467_v21  ;;  %v1452_v44 = vmul.f32 %v1403_v26, %v1356_v17  ;;  %v3090_v54 = vpop.f32.mrb[23].mxu0  ;;  %v1641_v51 = vmul.f32 %v1580_v33, %v1513_v42  ;;  %v1363_v21 = vld [vmem:[#allocation6 + $0x70] sm:$0xff] }
 0x7aa   : > { %v1468_v49 = vadd.f32 %v3055_v28, %v1452_v44  ;;  %2167 = vmatpush3.bf16.xpose.msk.msra.mxu1 %vm3073_vm12, %v2165_v11  ;;  %v1514_v36 = vld [vmem:[#allocation6 + $0x28] sm:$0xff]  ;;  %v1658_v48 = vmax.f32 %v1641_v51, 0.0 }
 0x7ab   : > { %v1585_v24 = vpop.permute.xlu0 %1584  ;;  %v1408_v15 = vpop.permute.xlu1 %1407  ;;  %2168 = vmatprep.subr.bf16.mxu1 %v2424_v43 }
 0x7ac   : > { %1484 = vst.msk [vmem:[#allocation6 + $0x38] sm:$0xff] %vm680_vm9, %v1468_v49  ;;  %v1642_v25 = vmul.f32 %v1585_v24, %v1514_v36  ;;  %v1453_v50 = vmul.f32 %v1408_v15, %v1357_v32  ;;  %v1364_v49 = vld [vmem:[#allocation6 + $0x78] sm:$0xff] }
 0x7ae   : > { %v1659_v57 = vmax.f32 %v1642_v25, 0.0  ;;  %v1469_v47 = vadd.f32 %v1453_v50, %v3061_v30 }
 0x7af   : > { %v1413_v29 = vpop.permute.xlu0 %1412  ;;  %v1590_v28 = vpop.permute.xlu1 %1589  ;;  %v1515_v55 = vld [vmem:[#allocation6 + $0x30] sm:$0xff] }
 0x7b0   : > { %v2169_v62 = vpack.c.bf16 %v1659_v57, %v1658_v48  ;;  %1485 = vst.msk [vmem:[#allocation6 + $0x40] sm:$0xff] %vm680_vm9, %v1469_v47  ;;  %v1454_v46 = vmul.f32 %v1413_v29, %v1358_v20  ;;  %v1643_v40 = vmul.f32 %v1590_v28, %v1515_v55 }
 0x7b2   : > { %v1470_v60 = vadd.f32 %v1454_v46, %v3066_v23  ;;  %2171 = vmatpush3.bf16.xpose.msk.msra.mxu1 %vm3073_vm12, %v2169_v62  ;;  %v1660_v58 = vmax.f32 %v1643_v40, 0.0 }
 0x7b3   : > { %v1595_v45 = vpop.permute.xlu0 %1594  ;;  %v1516_v56 = vld [vmem:[#allocation6 + $0x38] sm:$0xff]  ;;  %v1418_v6 = vpop.permute.xlu1 %1417  ;;  %2172 = vmatprep.subr.bf16.mxu1 %v2424_v43 }
 0x7b4   : > { %1486 = vst.msk [vmem:[#allocation6 + $0x48] sm:$0xff] %vm680_vm9, %v1470_v60  ;;  %v1644_v30 = vmul.f32 %v1595_v45, %v1516_v56  ;;  %v1455_v34 = vmul.f32 %v1418_v6, %v1359_v39 }
 0x7b6   : > { %v1661_v35 = vmax.f32 %v1644_v30, 0.0  ;;  %v1471_v53 = vadd.f32 %v3059_v16, %v1455_v34  ;;  %v1653_v34 = vld [vmem:[%s3194_s6] sm:$0xff] }
 0x7b7   : > { %v1423_v1 = vpop.permute.xlu0 %1422  ;;  %v1600_v23 = vpop.permute.xlu1 %1599  ;;  %v1517_v4 = vld [vmem:[#allocation6 + $0x40] sm:$0xff] }
 0x7b8   : > { %v2173_v2 = vpack.c.bf16 %v1661_v35, %v1660_v58  ;;  %1487 = vst.msk [vmem:[#allocation6 + $0x50] sm:$0xff] %vm680_vm9, %v1471_v53  ;;  %v1456_v22 = vmul.f32 %v1423_v1, %v1360_v59  ;;  %v1645_v41 = vmul.f32 %v1600_v23, %v1517_v4  ;;  %v2009_v58 = vld [vmem:[%s2578_s20] ss:$0 sm:$0xff]  ;;  %s2012_s20 = sshll.u32 %s2502_s17, 7  ;;  %s2425_s17 = smov [#allocation7]  }
 0x7b9   : > { %s3146_s26 = scalar_lea.hbm %s3198_s10, %s2012_s20 }
 0x7ba   : > { %v1472_v52 = vadd.f32 %v3063_v9, %v1456_v22  ;;  %2175 = vmatpush3.bf16.xpose.msk.msra.mxu1 %vm3073_vm12, %v2173_v2  ;;  %v1662_v7 = vmax.f32 %v1645_v41, 0.0 }
 0x7bb   : > { %v1605_v10 = vpop.permute.xlu0 %1604  ;;  %v1518_v0 = vld [vmem:[#allocation6 + $0x48] sm:$0xff]  ;;  %v1428_v3 = vpop.permute.xlu1 %1427  ;;  %2176 = vmatprep.subr.bf16.mxu1 %v2424_v43 }
 0x7bc   : > { %1488 = vst.msk [vmem:[#allocation6 + $0x58] sm:$0xff] %vm680_vm9, %v1472_v52  ;;  %v1646_v16 = vmul.f32 %v1605_v10, %v1518_v0  ;;  %v1457_v5 = vmul.f32 %v1428_v3, %v1361_v31  ;;  %v2352_v52 = vld [vmem:[%s2541_s29] sm:$0xff]  ;;  %s2357_s29 = sshll.u32 %s2425_s17, 4  ;;  %s2358_s29 = int_to_ptr.vmem [resolvable:$false] %s2357_s29 }
 0x7bd   : > { %s2359_s11 = scalar_lea.vmem %s2358_s29, 256  ;;  %p2360_p0 = scmp.lt.s32.totalorder %s3148_s18, %s2358_s29 }
 0x7be   : > { %v1663_v12 = vmax.f32 %v1646_v16, 0.0  ;;  %v1473_v63 = vadd.f32 %v1457_v5, %v3084_v13  ;;  %p2361_p1 = scmp.lt.s32.totalorder %s2359_s11, %s2353_s28 }
 0x7bf   : > { %v1433_v61 = vpop.permute.xlu0 %1432  ;;  %v1610_v9 = vpop.permute.xlu1 %1609  ;;  %v1519_v17 = vld [vmem:[#allocation6 + $0x50] sm:$0xff] }
 0x7c0   : > { %v2177_v8 = vpack.c.bf16 %v1663_v12, %v1662_v7  ;;  %1489 = vst.msk [vmem:[#allocation6 + $0x60] sm:$0xff] %vm680_vm9, %v1473_v63  ;;  %v1458_v27 = vmul.f32 %v1433_v61, %v1362_v38  ;;  %v1647_v33 = vmul.f32 %v1610_v9, %v1519_v17  ;;  %p2362_p2 = por %p2361_p1, %p2360_p0 }
 0x7c2   : > { %v1474_v26 = vadd.f32 %v1458_v27, %v3090_v54  ;;  %2179 = vmatpush3.bf16.xpose.msk.msra.mxu1 %vm3073_vm12, %v2177_v8  ;;  %v1664_v51 = vmax.f32 %v1647_v33, 0.0  ;;  %p2363_p3 = pnand %p2362_p2, %p2356_p13 }
 0x7c3   : > { %v1615_v42 = vpop.permute.xlu0 %1614  ;;  %v1520_v11 = vld [vmem:[#allocation6 + $0x58] sm:$0xff]  ;;  %v1438_v44 = vpop.permute.xlu1 %1437  ;;  %2180 = vmatprep.subr.bf16.mxu1 %v2424_v43 }
 0x7c4   : > { %1490 = vst.msk [vmem:[#allocation6 + $0x68] sm:$0xff] %vm680_vm9, %v1474_v26  ;;  %v1648_v13 = vmul.f32 %v1615_v42, %v1520_v11  ;;  %v1459_v32 = vmul.f32 %v1438_v44, %v1363_v21 }
 0x7c6   : > { %v1665_v36 = vmax.f32 %v1648_v13, 0.0  ;;  %v1475_v24 = vadd.f32 %v3082_v19, %v1459_v32 }
 0x7c7   : > { %v1443_v15 = vpop.permute.xlu0 %1442  ;;  %v1521_v29 = vld [vmem:[#allocation6 + $0x60] sm:$0xff] }
 0x7c8   : > { %v2181_v54 = vpack.c.bf16 %v1665_v36, %v1664_v51  ;;  %1491 = vst.msk [vmem:[#allocation6 + $0x70] sm:$0xff] %vm680_vm9, %v1475_v24  ;;  %v1460_v25 = vmul.f32 %v1443_v15, %v1364_v49 }
 0x7ca   : > { %v1476_v50 = vadd.f32 %v3087_v14, %v1460_v25  ;;  %2183 = vmatpush3.bf16.xpose.msk.msra.mxu1 %vm3073_vm12, %v2181_v54 }
 0x7cb   : > { %2184 = vmatprep.subr.bf16.mxu1 %v2424_v43  ;;  %v1625_v20 = vpop.permute.xlu0 %1624  ;;  %v1522_v48 = vld [vmem:[#allocation6 + $0x68] sm:$0xff] }
 0x7cc   : > { %1492 = vst.msk [vmem:[#allocation6 + $0x78] sm:$0xff] %vm680_vm9, %v1476_v50  ;;  %v1650_v57 = vmul.f32 %v1625_v20, %v1522_v48 }
 0x7ce   : > { %v1667_v28 = vmax.f32 %v1650_v57, 0.0 }
 0x7cf   : > { %v1523_v39 = vld [vmem:[#allocation6 + $0x70] sm:$0xff]  ;;  %v1635_v40 = vpop.permute.xlu0 %1634 }
 0x7d3   : > { %v1524_v62 = vld [vmem:[#allocation6 + $0x78] sm:$0xff]  ;;  %v1810_v4 = vpop.permute.xlu0 %1809 }
 0x7d4   : > { %v1652_v45 = vmul.f32 %v1635_v40, %v1524_v62 }
 0x7d6   : > { %v1669_v6 = vmax.f32 %v1652_v45, 0.0 }
 0x7f3   : > { %v1620_v47 = vpop.permute.xlu1 %1619 }
 0x7f4   : > { %v1649_v19 = vmul.f32 %v1620_v47, %v1521_v29 }
 0x7f6   : > { %v1666_v55 = vmax.f32 %v1649_v19, 0.0 }
 0x7f7   : > { %v1630_v46 = vpop.permute.xlu1 %1629 }
 0x7f8   : > { %v2185_v14 = vpack.c.bf16 %v1667_v28, %v1666_v55  ;;  %v1651_v60 = vmul.f32 %v1630_v46, %v1523_v39 }
 0x7fa   : > { %2187 = vmatpush3.bf16.xpose.msk.msra.mxu1 %vm3073_vm12, %v2185_v14  ;;  %v1668_v56 = vmax.f32 %v1651_v60, 0.0 }
 0x7fb   : > { %2188 = vmatprep.subr.bf16.mxu1 %v2424_v43  ;;  %v1674_v59 = vpop.permute.xlu1 %1673 }
 0x7fc   : > { %v2189_v30 = vpack.c.bf16 %v1669_v6, %v1668_v56 }
 0x802   : > { %2191 = vmatpush3.bf16.xpose.msk.msra.mxu1 %vm3073_vm12, %v2189_v30 }
 0x809   : > { %2153 = vmatmul.mubr.msk.f32.vlgmr.msra.gmra.mrb[16].mxu1 %vm680_vm9, %v1653_v34 }
 0x8dc   : > { %v1793_v35 = vpop.f32.mrb[16].mxu1 }
 0x8dd   : > { %v1794_v53 = vadd.f32 %v1793_v35, %v1674_v59  ;;  %v2154_v43 = vpop.f32.mrb[17].mxu1 }
 0x8df   : > { %v1803_v1 = vmul.f32 %v2009_v58, %v1794_v53 }
 0x8e1   : > { %v1804_v23 = vadd.f32 %v1803_v1, %v2592_v37 }
 0x8e3   : > { %2156 = vmatpush3.msra.mxu0 %v1804_v23 }
 0x8e4   : > { %2158 = vmatmul.mubr.msk.f32.vlgmr.msra.gmra.mrb[24].mxu0 %vm394_vm5, %v1805_v18 }
 0x9b7   : > { %v1881_v2 = vpop.f32.mrb[24].mxu0 }
 0x9b8   : > { %v1882_v22 = vadd.f32 %v1881_v2, %v1810_v4  ;;  %v2159_v31 = vpop.f32.mrb[25].mxu0 }
 0x9ba   : > { %v1885_v41 = vadd.f32 %v2352_v52, %v1882_v22 }
 0x9bc   : > { %v1886_v37 = vmul.f32 %v2009_v58, %v1885_v41 }
 0x9be   : > { %1887 = vst [vmem:[%s361_s12] sm:$0xff] %v1886_v37 }
 0x9bf   : > { %2366 = shalt.err (!%p2363_p3)
}
 0x9c0   : > { %s2367_s30 = scalar_lea.hbm %s3146_s26, 128  ;;  %s2371_s25 = scalar_lea.hbm %s3198_s10, 256 }
 0x9c1   : > { %p2368_p4 = scmp.ne.s32.totalorder %s3146_s26, %s2367_s30  ;;  %p2372_p9 = scmp.lt.u32.totalorder %s3146_s26, %s3198_s10 }
 0x9c2   : > { %p2373_p10 = scmp.lt.u32.totalorder %s2371_s25, %s2367_s30  ;;  %p2375_p12 = scmp.lt.u32.totalorder %s2367_s30, %s3146_s26 }
 0x9c3   : > { %p2369_p7 = pnand %p2368_p4, %p2519_p5 }
 0x9c4   : > { %p2374_p11 = por %p2373_p10, %p2372_p9 }
 0x9c5   : > { %p2370_p8 = pneg %p2369_p7 }
 0x9c6   : > { %p2376_p13 = por %p2375_p12, %p2374_p11 }
 0x9c8   : > { %p2377_p0 = pnand %p2376_p13, %p2370_p8 }
 0x9ca   : > { %2380 = shalt.err (!%p2377_p0)
}
 0x9cb   : > { %2202 = dma.vmem_to_hbm [thread:$0]  (%p2519_p5), %s3148_s18, 128, %s3146_s26, %s1889_s27  }
 0x9cc PF: > { %p2208_p1 = scmp.ge.s32.totalorder %s2415_s16, 2  ;;  %s1914_s28 = sand.u32 1, %s2403_s13  }
 0x9cd   : > { %s1915_s29 = scalar_lea.sflag [#allocation8], %s1914_s28 }
 0x9ce   : > { %p2205_p2 = pnand %p2208_p1, %p2523_p6 }
 0x9d0   : > { %2398 = dma.done.wait (!%p2205_p2), %s1915_s29, 128  }
 0x9d1   : > { %2400 = vsyncadd (!%p2205_p2), %s1915_s29, 4294967168  ;;  %p20_p3 = scmp.ge.s32.totalorder %s2506_s19, 4   ;;  %s3223_s13 = smov %s2407_s14 }
 0x9d2   : > { %s3224_s14 = smov %s2411_s15  ;;  %s3225_s15 = smov %s2517_s22 }
 0x9d3   : > { %s3226_s16 = smov %s2506_s19  ;;  %22 = sbr.rel (!%p20_p3) target bundleno = 3 (0x3), region = 100 }
 0x9da   :  { %1920 = vsyncpa [#allocation8], 1 }
 0x9db   :  { %1922 = vsyncpa [#allocation8 + $0x1], 1 }

</bundles_post_ra>
